<compile_context>
chip_gen: v7x
topology: tpu7x:2x2x1
jax: 0.10.0
libtpu: 0.0.40
codegen_flags: <defaults>
</compile_context>

<pallas_src>
import math
import functools

import jax
import jax.numpy as jnp
import numpy as np
from jax.experimental import pallas as pl
from jax.experimental.pallas import tpu as pltpu


# ----------------------------------------------------------------------------
# Helpers
# ----------------------------------------------------------------------------
def _gelu_tanh(x):
    c = math.sqrt(2.0 / math.pi)
    return 0.5 * x * (1.0 + jnp.tanh(c * (x + 0.044715 * x * x * x)))


def _pick_batch_block(B, L, target_rows=512, min_grid=2):
    """Largest batch block (divisor of B) keeping rows <= target and, when
    possible, >= min_grid grid steps (megacore). Requires L % 8 == 0 to merge
    batch/seq rows without crossing sublane tiles."""
    if L % 8 != 0:
        return 1
    divisors = [d for d in range(1, B + 1) if B % d == 0]
    feasible = [d for d in divisors if d * L <= max(target_rows, L)]
    keep_grid = [d for d in feasible if B // d >= min_grid]
    pool = keep_grid or feasible or [1]
    return max(pool)


# ----------------------------------------------------------------------------
# Fused encoder-layer kernel (one grid step == `batch_block` batch elements)
# ----------------------------------------------------------------------------
def _encoder_layer_kernel(
    x_ref,            # (Bb, L, d_model) f32
    wqkv_ref,         # (d_model, 3*H*E) compute dtype (scale folded into Q cols)
    bqkv_ref,         # (1, 3*H*E)       f32 (scale folded into Q part)
    wo_ref,           # (H*E, d_model)   compute dtype
    bo_ref,           # (1, d_model)     f32
    bn1_scale_ref,    # (1, d_model)     f32  gamma / sqrt(var+eps)
    bn1_shift_ref,    # (1, d_model)     f32  beta - mean*scale
    w1_ref,           # (d_model, d_ff)  compute dtype
    b1_ref,           # (1, d_ff)        f32
    w2_ref,           # (d_ff, d_model)  compute dtype
    b2_ref,           # (1, d_model)     f32
    bn2_scale_ref,    # (1, d_model)     f32
    bn2_shift_ref,    # (1, d_model)     f32
    o_ref,            # (Bb, L, d_model) f32
    *, batch_block, seq_len, n_heads, head_dim, d_model, d_ff, ffn_chunk,
    approx_recip,
):
    Bb, L, H, E = batch_block, seq_len, n_heads, head_dim
    HD = H * E
    rows = Bb * L
    cdt = wqkv_ref.dtype                       # MXU input dtype (bf16 or f32)

    # Flatten (Bb, L, d) -> (Bb*L, d): big MXU M dimension for all projections.
    x = x_ref[...].reshape(rows, d_model)      # f32 (kept f32 for residuals)

    # ---- fused QKV projection: single MXU pass, f32 accumulation ------------
    qkv = jnp.dot(x.astype(cdt), wqkv_ref[...],
                  preferred_element_type=jnp.float32) + bqkv_ref[...]   # (rows, 3HE)

    # ---- multi-head attention; per-head out-projection accumulation ---------
    attn_rows = []
    for b in range(Bb):                        # trace-time unrolled
        r0 = b * L
        acc = jnp.zeros((L, d_model), jnp.float32)
        for h in range(H):
            q = qkv[r0:r0 + L, h * E:(h + 1) * E]                     # (L, E)
            k = qkv[r0:r0 + L, HD + h * E:HD + (h + 1) * E]           # (S, E)
            v = qkv[r0:r0 + L, 2 * HD + h * E:2 * HD + (h + 1) * E]   # (S, E)

            # scale already folded into q via wqkv
            s = jnp.einsum("le,se->ls", q.astype(cdt), k.astype(cdt),
                           preferred_element_type=jnp.float32)        # (L, S)
            m = jnp.max(s, axis=-1, keepdims=True)
            p = jnp.exp(s - m)                                        # (0, 1]
            denom = jnp.sum(p, axis=-1, keepdims=True)
            # unnormalized P@V first, then normalize the (L,E) result (EUP slot)
            pv = jnp.dot(p.astype(cdt), v.astype(cdt),
                         preferred_element_type=jnp.float32)          # (L, E)
            pv = pv * pl.reciprocal(denom, approx=approx_recip)
            # per-head output projection accumulation (sublane-aligned wo slice)
            acc = acc + jnp.dot(pv.astype(cdt), wo_ref[h * E:(h + 1) * E, :],
                                preferred_element_type=jnp.float32)   # (L, d_model)
        attn_rows.append(acc)
    attn = attn_rows[0] if Bb == 1 else jnp.concatenate(attn_rows, axis=0)
    attn = attn + bo_ref[...]                                          # (rows, d_model)

    # ---- residual 1 + BatchNorm1 (eval-mode, folded scale/shift) -------------
    x1 = x + attn
    x1 = x1 * bn1_scale_ref[...] + bn1_shift_ref[...]

    # ---- position-wise FFN, tiled over d_ff (no full (rows, d_ff) buffer) ----
    x1c = x1.astype(cdt)
    ffn = jnp.zeros((rows, d_model), jnp.float32)
    for c0 in range(0, d_ff, ffn_chunk):
        c1 = min(c0 + ffn_chunk, d_ff)
        h1 = jnp.dot(x1c, w1_ref[:, c0:c1],
                     preferred_element_type=jnp.float32) + b1_ref[:, c0:c1]
        h1 = _gelu_tanh(h1)
        ffn = ffn + jnp.dot(h1.astype(cdt), w2_ref[c0:c1, :],
                            preferred_element_type=jnp.float32)
    ffn = ffn + b2_ref[...]

    # ---- residual 2 + BatchNorm2 ---------------------------------------------
    x2 = x1 + ffn
    out = x2 * bn2_scale_ref[...] + bn2_shift_ref[...]
    o_ref[...] = out.reshape(Bb, L, d_model)


# ----------------------------------------------------------------------------
# Wrapper
# ----------------------------------------------------------------------------
def encoder_layer_forward(x, params, n_heads, *, eps=1e-5,
                          compute_dtype=jnp.bfloat16,   # bf16 MXU inputs by default
                          approx_recip=None,            # default: EUP approx recip
                          ffn_chunk=512):
    """Full EncoderLayer forward. x: (B, L, d_model) float32 -> (B, L, d_model)."""
    B, L, d_model = x.shape
    H = n_heads
    E = params["wq"].shape[1] // H          # head dim (d_keys == d_values)
    HD = H * E
    d_ff = params["w1"].shape[1]
    if approx_recip is None:
        approx_recip = True                 # EUP slot otherwise idle; ~1e-3 perturbation

    # Fold the softmax scale 1/sqrt(E) into the Q projection (weight + bias);
    # fuse Q/K/V into one (d_model, 3*H*E) matrix. Big matrices cast to the
    # compute dtype for the MXU; biases / norm affines stay f32.
    scale = 1.0 / math.sqrt(E)              # learnable_scale=False
    wqkv = jnp.concatenate([params["wq"] * scale, params["wk"], params["wv"]],
                           axis=1).astype(compute_dtype)
    bqkv = jnp.concatenate([params["bq"] * scale, params["bk"], params["bv"]]
                           )[None, :].astype(jnp.float32)
    wo = params["wo"].astype(compute_dtype)
    bo = params["bo"][None, :].astype(jnp.float32)
    w1 = params["w1"].astype(compute_dtype)
    b1 = params["b1"][None, :].astype(jnp.float32)
    w2 = params["w2"].astype(compute_dtype)
    b2 = params["b2"][None, :].astype(jnp.float32)

    def bn_affine(prefix):
        g = params[f"{prefix}_gamma"]
        b = params[f"{prefix}_beta"]
        m = params[f"{prefix}_mean"]
        v = params[f"{prefix}_var"]
        s = g / jnp.sqrt(v + eps)
        return s[None, :].astype(jnp.float32), (b - m * s)[None, :].astype(jnp.float32)

    bn1_s, bn1_b = bn_affine("bn1")
    bn2_s, bn2_b = bn_affine("bn2")

    bb = _pick_batch_block(B, L)
    grid = (B // bb,)
    rows = bb * L
    ffn_chunk = int(min(ffn_chunk, d_ff))

    kernel = functools.partial(
        _encoder_layer_kernel,
        batch_block=bb, seq_len=L, n_heads=H, head_dim=E,
        d_model=d_model, d_ff=d_ff, ffn_chunk=ffn_chunk,
        approx_recip=bool(approx_recip))

    x_f32 = x.astype(jnp.float32)
    weights = [wqkv, bqkv, wo, bo, bn1_s, bn1_b, w1, b1, w2, b2, bn2_s, bn2_b]
    inputs = [x_f32] + weights

    # --- advisory cost estimate ------------------------------------------------
    flops = (2 * B * L * d_model * 3 * HD          # QKV projection
             + 4 * B * H * L * L * E               # scores + P@V
             + 2 * B * L * HD * d_model            # output projection
             + 4 * B * L * d_model * d_ff)         # FFN
    transcendentals = B * H * L * (L + 1) + B * L * d_ff
    bytes_accessed = int(sum(int(a.size) * a.dtype.itemsize for a in inputs)
                         + B * L * d_model * 4)

    # --- VMEM budget from actual buffer footprint (weights single-buffered,
    #     x/out double-buffered, plus activation slabs), with headroom ---------
    weight_bytes = sum(int(a.size) * a.dtype.itemsize for a in weights)
    io_bytes = 2 * 2 * rows * d_model * 4
    act_bytes = rows * (3 * HD + 6 * d_model + 2 * ffn_chunk) * 4
    vmem_limit = int(min(max(2 * (weight_bytes + io_bytes + act_bytes),
                             32 * 1024 * 1024),
                         100 * 1024 * 1024))

    def build(weight_pipeline_mode):
        def wspec(arr):
            if weight_pipeline_mode is None:
                return pl.BlockSpec(arr.shape, lambda i: (0, 0))
            return pl.BlockSpec(arr.shape, lambda i: (0, 0),
                                pipeline_mode=weight_pipeline_mode)
        return pl.pallas_call(
            kernel,
            out_shape=jax.ShapeDtypeStruct((B, L, d_model), jnp.float32),
            grid=grid,
            in_specs=[pl.BlockSpec((bb, L, d_model), lambda i: (i, 0, 0))]
                     + [wspec(a) for a in weights],
            out_specs=pl.BlockSpec((bb, L, d_model), lambda i: (i, 0, 0)),
            compiler_params=pltpu.CompilerParams(
                dimension_semantics=("parallel",),      # shard grid across TCs
                vmem_limit_bytes=vmem_limit),
            cost_estimate=pl.CostEstimate(
                flops=int(flops),
                transcendentals=int(transcendentals),
                bytes_accessed=bytes_accessed),
        )

    try:
        # Resident weights have a constant index_map -> single-buffer them
        # (halves resident-weight VMEM; key for v7x's 64 MiB VMEM).
        return build(pl.Buffered(1))(*inputs)
    except Exception:
        # Fallback for JAX versions where pipeline_mode on a top-level
        # pallas_call BlockSpec is unsupported: default double-buffering.
        return build(None)(*inputs)


# ----------------------------------------------------------------------------
# Deterministic parameter init (PyTorch nn.Linear-style uniform bounds;
# BatchNorm running stats randomized so the eval-mode norm is non-trivial).
# ----------------------------------------------------------------------------
def init_params(key, d_model, n_heads, d_ff):
    d_head = d_model // n_heads

    def make_linear(key, d_in, d_out):
        kw, kb = jax.random.split(key)
        bound = 1.0 / math.sqrt(d_in)
        w = jax.random.uniform(kw, (d_in, d_out), jnp.float32, -bound, bound)
        b = jax.random.uniform(kb, (d_out,), jnp.float32, -bound, bound)
        return w, b

    def make_bn(key, dim):
        kg, kb, km, kv = jax.random.split(key, 4)
        gamma = jax.random.uniform(kg, (dim,), jnp.float32, 0.5, 1.5)
        beta = 0.2 * jax.random.normal(kb, (dim,), jnp.float32)
        mean = 0.2 * jax.random.normal(km, (dim,), jnp.float32)
        var = jax.random.uniform(kv, (dim,), jnp.float32, 0.5, 1.5)
        return gamma, beta, mean, var

    keys = jax.random.split(key, 8)
    wq, bq = make_linear(keys[0], d_model, d_head * n_heads)
    wk, bk = make_linear(keys[1], d_model, d_head * n_heads)
    wv, bv = make_linear(keys[2], d_model, d_head * n_heads)
    wo, bo = make_linear(keys[3], d_head * n_heads, d_model)
    w1, b1 = make_linear(keys[4], d_model, d_ff)
    w2, b2 = make_linear(keys[5], d_ff, d_model)
    g1, be1, m1, v1 = make_bn(keys[6], d_model)
    g2, be2, m2, v2 = make_bn(keys[7], d_model)
    return dict(wq=wq, bq=bq, wk=wk, bk=bk, wv=wv, bv=bv, wo=wo, bo=bo,
                w1=w1, b1=b1, w2=w2, b2=b2,
                bn1_gamma=g1, bn1_beta=be1, bn1_mean=m1, bn1_var=v1,
                bn2_gamma=g2, bn2_beta=be2, bn2_mean=m2, bn2_var=v2)


# ----------------------------------------------------------------------------
# Pure-JAX reference (f32) for correctness checking.
# ----------------------------------------------------------------------------
def _bn_eval(x, params, prefix, eps):
    g = params[f"{prefix}_gamma"]
    b = params[f"{prefix}_beta"]
    m = params[f"{prefix}_mean"]
    v = params[f"{prefix}_var"]
    return (x - m) / jnp.sqrt(v + eps) * g + b


def _reference_forward(x, params, n_heads, eps=1e-5):
    B, L, d_model = x.shape
    H = n_heads
    with jax.default_matmul_precision("highest"):
        q = (x @ params["wq"] + params["bq"]).reshape(B, L, H, -1)
        k = (x @ params["wk"] + params["bk"]).reshape(B, L, H, -1)
        v = (x @ params["wv"] + params["bv"]).reshape(B, L, H, -1)
        E = q.shape[-1]
        scale = 1.0 / math.sqrt(E)
        scores = jnp.einsum("blhe,bshe->bhls", q, k)
        A = jax.nn.softmax(scale * scores, axis=-1)
        V = jnp.einsum("bhls,bshd->blhd", A, v)
        attn = V.reshape(B, L, -1) @ params["wo"] + params["bo"]
        x1 = x + attn
        x1 = _bn_eval(x1, params, "bn1", eps)
        h = _gelu_tanh(x1 @ params["w1"] + params["b1"])
        ffn = h @ params["w2"] + params["b2"]
        x2 = x1 + ffn
        x2 = _bn_eval(x2, params, "bn2", eps)
    return x2


if __name__ == "__main__":
    # ---- config A: B=2, L=16 (one batch element per grid step) -------------
    B, L, d_model, n_heads, d_ff = 2, 16, 32, 4, 64
    key = jax.random.PRNGKey(0)
    kx, kp, kx2, kp2 = jax.random.split(key, 4)
    x = jax.random.normal(kx, (B, L, d_model), jnp.float32)
    params = init_params(kp, d_model, n_heads, d_ff)
    ref = _reference_forward(x, params, n_heads)

    # strict semantic check: f32 MXU inputs, exact softmax reciprocal
    out_f32 = jax.block_until_ready(
        encoder_layer_forward(x, params, n_heads,
                              compute_dtype=jnp.float32, approx_recip=False))
    np.testing.assert_allclose(np.asarray(out_f32), np.asarray(ref),
                               rtol=5e-4, atol=5e-4)

    # default fast path: bf16 MXU inputs + approx EUP reciprocal (f32 accumulate)
    out_fast = jax.block_until_ready(encoder_layer_forward(x, params, n_heads))
    np.testing.assert_allclose(np.asarray(out_fast), np.asarray(ref),
                               rtol=5e-2, atol=5e-2)

    # ---- config B: B=4, L=8 -> exercises multi-batch-per-step path ---------
    B2, L2 = 4, 8
    x2 = jax.random.normal(kx2, (B2, L2, d_model), jnp.float32)
    params2 = init_params(kp2, d_model, n_heads, d_ff)
    ref2 = _reference_forward(x2, params2, n_heads)
    out2 = jax.block_until_ready(
        encoder_layer_forward(x2, params2, n_heads,
                              compute_dtype=jnp.float32, approx_recip=False))
    np.testing.assert_allclose(np.asarray(out2), np.asarray(ref2),
                               rtol=5e-4, atol=5e-4)

    print("KERNEL_OK")
</pallas_src>

<mosaic_0001>
module attributes {stable_mosaic.version = 11 : i64} {
  func.func @_encoder_layer_kernel(%arg0: i32, %arg1: memref<1x16x32xf32, #tpu.memory_space<vmem>>, %arg2: memref<32x96xf32, #tpu.memory_space<vmem>>, %arg3: memref<1x96xf32, #tpu.memory_space<vmem>>, %arg4: memref<32x32xf32, #tpu.memory_space<vmem>>, %arg5: memref<1x32xf32, #tpu.memory_space<vmem>>, %arg6: memref<1x32xf32, #tpu.memory_space<vmem>>, %arg7: memref<1x32xf32, #tpu.memory_space<vmem>>, %arg8: memref<32x64xf32, #tpu.memory_space<vmem>>, %arg9: memref<1x64xf32, #tpu.memory_space<vmem>>, %arg10: memref<64x32xf32, #tpu.memory_space<vmem>>, %arg11: memref<1x32xf32, #tpu.memory_space<vmem>>, %arg12: memref<1x32xf32, #tpu.memory_space<vmem>>, %arg13: memref<1x32xf32, #tpu.memory_space<vmem>>, %arg14: memref<1x16x32xf32, #tpu.memory_space<vmem>>) attributes {dimension_semantics = [#tpu.dimension_semantics<parallel>], iteration_bounds = array<i64: 2>, scalar_prefetch = 0 : i64, scratch_operands = 0 : i64, tpu.core_type = #tpu.core_type<tc>, window_params = [{transform_indices = @transform_0, window_bounds = array<i64: 1, 16, 32>}, {pipeline_mode = #tpu.pipeline_mode<synchronous>, transform_indices = @transform_1, window_bounds = array<i64: 32, 96>}, {pipeline_mode = #tpu.pipeline_mode<synchronous>, transform_indices = @transform_2, window_bounds = array<i64: 1, 96>}, {pipeline_mode = #tpu.pipeline_mode<synchronous>, transform_indices = @transform_3, window_bounds = array<i64: 32, 32>}, {pipeline_mode = #tpu.pipeline_mode<synchronous>, transform_indices = @transform_4, window_bounds = array<i64: 1, 32>}, {pipeline_mode = #tpu.pipeline_mode<synchronous>, transform_indices = @transform_5, window_bounds = array<i64: 1, 32>}, {pipeline_mode = #tpu.pipeline_mode<synchronous>, transform_indices = @transform_6, window_bounds = array<i64: 1, 32>}, {pipeline_mode = #tpu.pipeline_mode<synchronous>, transform_indices = @transform_7, window_bounds = array<i64: 32, 64>}, {pipeline_mode = #tpu.pipeline_mode<synchronous>, transform_indices = @transform_8, window_bounds = array<i64: 1, 64>}, {pipeline_mode = #tpu.pipeline_mode<synchronous>, transform_indices = @transform_9, window_bounds = array<i64: 64, 32>}, {pipeline_mode = #tpu.pipeline_mode<synchronous>, transform_indices = @transform_10, window_bounds = array<i64: 1, 32>}, {pipeline_mode = #tpu.pipeline_mode<synchronous>, transform_indices = @transform_11, window_bounds = array<i64: 1, 32>}, {pipeline_mode = #tpu.pipeline_mode<synchronous>, transform_indices = @transform_12, window_bounds = array<i64: 1, 32>}, {transform_indices = @transform_13, window_bounds = array<i64: 1, 16, 32>}]} {
    %c0 = arith.constant 0 : index
    %c0_0 = arith.constant 0 : index
    %c0_1 = arith.constant 0 : index
    %0 = vector.load %arg1[%c0, %c0_0, %c0_1] : memref<1x16x32xf32, #tpu.memory_space<vmem>>, vector<1x16x32xf32>
    %1 = vector.shape_cast %0 : vector<1x16x32xf32> to vector<16x32xf32>
    %c0_2 = arith.constant 0 : index
    %c0_3 = arith.constant 0 : index
    %2 = vector.load %arg2[%c0_2, %c0_3] : memref<32x96xf32, #tpu.memory_space<vmem>>, vector<32x96xf32>
    %cst = arith.constant dense<0.000000e+00> : vector<16x96xf32>
    %3 = tpu.matmul %1, %2, %cst {dimension_numbers = #tpu.dot_dimension_numbers<[1], [0], [0], [1], [0, 0, 1, 1], [], []>} : vector<16x32xf32>, vector<32x96xf32>, vector<16x96xf32> -> vector<16x96xf32>
    %c0_4 = arith.constant 0 : index
    %c0_5 = arith.constant 0 : index
    %4 = vector.load %arg3[%c0_4, %c0_5] : memref<1x96xf32, #tpu.memory_space<vmem>>, vector<1x96xf32>
    %5 = vector.broadcast %4 : vector<1x96xf32> to vector<16x96xf32>
    %6 = arith.addf %3, %5 : vector<16x96xf32>
    %cst_6 = arith.constant 0.000000e+00 : f32
    %7 = vector.broadcast %cst_6 : f32 to vector<16x32xf32>
    %8 = vector.extract_strided_slice %6 {offsets = [0, 0], sizes = [16, 8], strides = [1, 1]} : vector<16x96xf32> to vector<16x8xf32>
    %9 = vector.extract_strided_slice %6 {offsets = [0, 32], sizes = [16, 8], strides = [1, 1]} : vector<16x96xf32> to vector<16x8xf32>
    %10 = vector.extract_strided_slice %6 {offsets = [0, 64], sizes = [16, 8], strides = [1, 1]} : vector<16x96xf32> to vector<16x8xf32>
    "tpu.trace_start"() <{level = 10 : i32, message = "le,se->ls"}> : () -> ()
    %cst_7 = arith.constant dense<0.000000e+00> : vector<16x16xf32>
    %11 = tpu.matmul %8, %9, %cst_7 {dimension_numbers = #tpu.dot_dimension_numbers<[1], [1], [0], [0], [0, 0, 1, 0], [], []>} : vector<16x8xf32>, vector<16x8xf32>, vector<16x16xf32> -> vector<16x16xf32>
    "tpu.trace_stop"() : () -> ()
    %cst_8 = arith.constant dense<0xFF800000> : vector<16xf32>
    %12 = vector.multi_reduction <maximumf>, %11, %cst_8 [1] : vector<16x16xf32> to vector<16xf32>
    %13 = vector.shape_cast %12 : vector<16xf32> to vector<16x1xf32>
    %14 = vector.broadcast %13 : vector<16x1xf32> to vector<16x16xf32>
    %15 = arith.subf %11, %14 : vector<16x16xf32>
    %16 = math.exp %15 : vector<16x16xf32>
    %cst_9 = arith.constant dense<0.000000e+00> : vector<16xf32>
    %17 = vector.multi_reduction <add>, %16, %cst_9 [1] : vector<16x16xf32> to vector<16xf32>
    %18 = vector.shape_cast %17 : vector<16xf32> to vector<16x1xf32>
    %cst_10 = arith.constant dense<0.000000e+00> : vector<16x8xf32>
    %19 = tpu.matmul %16, %10, %cst_10 {dimension_numbers = #tpu.dot_dimension_numbers<[1], [0], [0], [1], [0, 0, 1, 1], [], []>} : vector<16x16xf32>, vector<16x8xf32>, vector<16x8xf32> -> vector<16x8xf32>
    %20 = tpu.reciprocal %18 : vector<16x1xf32> -> vector<16x1xf32>
    %21 = vector.broadcast %20 : vector<16x1xf32> to vector<16x8xf32>
    %22 = arith.mulf %19, %21 : vector<16x8xf32>
    %c0_11 = arith.constant 0 : index
    %c0_12 = arith.constant 0 : index
    %23 = vector.load %arg4[%c0_11, %c0_12] : memref<32x32xf32, #tpu.memory_space<vmem>>, vector<8x32xf32>
    %cst_13 = arith.constant dense<0.000000e+00> : vector<16x32xf32>
    %24 = tpu.matmul %22, %23, %cst_13 {dimension_numbers = #tpu.dot_dimension_numbers<[1], [0], [0], [1], [0, 0, 1, 1], [], []>} : vector<16x8xf32>, vector<8x32xf32>, vector<16x32xf32> -> vector<16x32xf32>
    %25 = arith.addf %7, %24 : vector<16x32xf32>
    %26 = vector.extract_strided_slice %6 {offsets = [0, 8], sizes = [16, 8], strides = [1, 1]} : vector<16x96xf32> to vector<16x8xf32>
    %27 = vector.extract_strided_slice %6 {offsets = [0, 40], sizes = [16, 8], strides = [1, 1]} : vector<16x96xf32> to vector<16x8xf32>
    %28 = vector.extract_strided_slice %6 {offsets = [0, 72], sizes = [16, 8], strides = [1, 1]} : vector<16x96xf32> to vector<16x8xf32>
    "tpu.trace_start"() <{level = 10 : i32, message = "le,se->ls"}> : () -> ()
    %cst_14 = arith.constant dense<0.000000e+00> : vector<16x16xf32>
    %29 = tpu.matmul %26, %27, %cst_14 {dimension_numbers = #tpu.dot_dimension_numbers<[1], [1], [0], [0], [0, 0, 1, 0], [], []>} : vector<16x8xf32>, vector<16x8xf32>, vector<16x16xf32> -> vector<16x16xf32>
    "tpu.trace_stop"() : () -> ()
    %cst_15 = arith.constant dense<0xFF800000> : vector<16xf32>
    %30 = vector.multi_reduction <maximumf>, %29, %cst_15 [1] : vector<16x16xf32> to vector<16xf32>
    %31 = vector.shape_cast %30 : vector<16xf32> to vector<16x1xf32>
    %32 = vector.broadcast %31 : vector<16x1xf32> to vector<16x16xf32>
    %33 = arith.subf %29, %32 : vector<16x16xf32>
    %34 = math.exp %33 : vector<16x16xf32>
    %cst_16 = arith.constant dense<0.000000e+00> : vector<16xf32>
    %35 = vector.multi_reduction <add>, %34, %cst_16 [1] : vector<16x16xf32> to vector<16xf32>
    %36 = vector.shape_cast %35 : vector<16xf32> to vector<16x1xf32>
    %cst_17 = arith.constant dense<0.000000e+00> : vector<16x8xf32>
    %37 = tpu.matmul %34, %28, %cst_17 {dimension_numbers = #tpu.dot_dimension_numbers<[1], [0], [0], [1], [0, 0, 1, 1], [], []>} : vector<16x16xf32>, vector<16x8xf32>, vector<16x8xf32> -> vector<16x8xf32>
    %38 = tpu.reciprocal %36 : vector<16x1xf32> -> vector<16x1xf32>
    %39 = vector.broadcast %38 : vector<16x1xf32> to vector<16x8xf32>
    %40 = arith.mulf %37, %39 : vector<16x8xf32>
    %c8 = arith.constant 8 : index
    %c0_18 = arith.constant 0 : index
    %41 = vector.load %arg4[%c8, %c0_18] : memref<32x32xf32, #tpu.memory_space<vmem>>, vector<8x32xf32>
    %cst_19 = arith.constant dense<0.000000e+00> : vector<16x32xf32>
    %42 = tpu.matmul %40, %41, %cst_19 {dimension_numbers = #tpu.dot_dimension_numbers<[1], [0], [0], [1], [0, 0, 1, 1], [], []>} : vector<16x8xf32>, vector<8x32xf32>, vector<16x32xf32> -> vector<16x32xf32>
    %43 = arith.addf %25, %42 : vector<16x32xf32>
    %44 = vector.extract_strided_slice %6 {offsets = [0, 16], sizes = [16, 8], strides = [1, 1]} : vector<16x96xf32> to vector<16x8xf32>
    %45 = vector.extract_strided_slice %6 {offsets = [0, 48], sizes = [16, 8], strides = [1, 1]} : vector<16x96xf32> to vector<16x8xf32>
    %46 = vector.extract_strided_slice %6 {offsets = [0, 80], sizes = [16, 8], strides = [1, 1]} : vector<16x96xf32> to vector<16x8xf32>
    "tpu.trace_start"() <{level = 10 : i32, message = "le,se->ls"}> : () -> ()
    %cst_20 = arith.constant dense<0.000000e+00> : vector<16x16xf32>
    %47 = tpu.matmul %44, %45, %cst_20 {dimension_numbers = #tpu.dot_dimension_numbers<[1], [1], [0], [0], [0, 0, 1, 0], [], []>} : vector<16x8xf32>, vector<16x8xf32>, vector<16x16xf32> -> vector<16x16xf32>
    "tpu.trace_stop"() : () -> ()
    %cst_21 = arith.constant dense<0xFF800000> : vector<16xf32>
    %48 = vector.multi_reduction <maximumf>, %47, %cst_21 [1] : vector<16x16xf32> to vector<16xf32>
    %49 = vector.shape_cast %48 : vector<16xf32> to vector<16x1xf32>
    %50 = vector.broadcast %49 : vector<16x1xf32> to vector<16x16xf32>
    %51 = arith.subf %47, %50 : vector<16x16xf32>
    %52 = math.exp %51 : vector<16x16xf32>
    %cst_22 = arith.constant dense<0.000000e+00> : vector<16xf32>
    %53 = vector.multi_reduction <add>, %52, %cst_22 [1] : vector<16x16xf32> to vector<16xf32>
    %54 = vector.shape_cast %53 : vector<16xf32> to vector<16x1xf32>
    %cst_23 = arith.constant dense<0.000000e+00> : vector<16x8xf32>
    %55 = tpu.matmul %52, %46, %cst_23 {dimension_numbers = #tpu.dot_dimension_numbers<[1], [0], [0], [1], [0, 0, 1, 1], [], []>} : vector<16x16xf32>, vector<16x8xf32>, vector<16x8xf32> -> vector<16x8xf32>
    %56 = tpu.reciprocal %54 : vector<16x1xf32> -> vector<16x1xf32>
    %57 = vector.broadcast %56 : vector<16x1xf32> to vector<16x8xf32>
    %58 = arith.mulf %55, %57 : vector<16x8xf32>
    %c16 = arith.constant 16 : index
    %c0_24 = arith.constant 0 : index
    %59 = vector.load %arg4[%c16, %c0_24] : memref<32x32xf32, #tpu.memory_space<vmem>>, vector<8x32xf32>
    %cst_25 = arith.constant dense<0.000000e+00> : vector<16x32xf32>
    %60 = tpu.matmul %58, %59, %cst_25 {dimension_numbers = #tpu.dot_dimension_numbers<[1], [0], [0], [1], [0, 0, 1, 1], [], []>} : vector<16x8xf32>, vector<8x32xf32>, vector<16x32xf32> -> vector<16x32xf32>
    %61 = arith.addf %43, %60 : vector<16x32xf32>
    %62 = vector.extract_strided_slice %6 {offsets = [0, 24], sizes = [16, 8], strides = [1, 1]} : vector<16x96xf32> to vector<16x8xf32>
    %63 = vector.extract_strided_slice %6 {offsets = [0, 56], sizes = [16, 8], strides = [1, 1]} : vector<16x96xf32> to vector<16x8xf32>
    %64 = vector.extract_strided_slice %6 {offsets = [0, 88], sizes = [16, 8], strides = [1, 1]} : vector<16x96xf32> to vector<16x8xf32>
    "tpu.trace_start"() <{level = 10 : i32, message = "le,se->ls"}> : () -> ()
    %cst_26 = arith.constant dense<0.000000e+00> : vector<16x16xf32>
    %65 = tpu.matmul %62, %63, %cst_26 {dimension_numbers = #tpu.dot_dimension_numbers<[1], [1], [0], [0], [0, 0, 1, 0], [], []>} : vector<16x8xf32>, vector<16x8xf32>, vector<16x16xf32> -> vector<16x16xf32>
    "tpu.trace_stop"() : () -> ()
    %cst_27 = arith.constant dense<0xFF800000> : vector<16xf32>
    %66 = vector.multi_reduction <maximumf>, %65, %cst_27 [1] : vector<16x16xf32> to vector<16xf32>
    %67 = vector.shape_cast %66 : vector<16xf32> to vector<16x1xf32>
    %68 = vector.broadcast %67 : vector<16x1xf32> to vector<16x16xf32>
    %69 = arith.subf %65, %68 : vector<16x16xf32>
    %70 = math.exp %69 : vector<16x16xf32>
    %cst_28 = arith.constant dense<0.000000e+00> : vector<16xf32>
    %71 = vector.multi_reduction <add>, %70, %cst_28 [1] : vector<16x16xf32> to vector<16xf32>
    %72 = vector.shape_cast %71 : vector<16xf32> to vector<16x1xf32>
    %cst_29 = arith.constant dense<0.000000e+00> : vector<16x8xf32>
    %73 = tpu.matmul %70, %64, %cst_29 {dimension_numbers = #tpu.dot_dimension_numbers<[1], [0], [0], [1], [0, 0, 1, 1], [], []>} : vector<16x16xf32>, vector<16x8xf32>, vector<16x8xf32> -> vector<16x8xf32>
    %74 = tpu.reciprocal %72 : vector<16x1xf32> -> vector<16x1xf32>
    %75 = vector.broadcast %74 : vector<16x1xf32> to vector<16x8xf32>
    %76 = arith.mulf %73, %75 : vector<16x8xf32>
    %c24 = arith.constant 24 : index
    %c0_30 = arith.constant 0 : index
    %77 = vector.load %arg4[%c24, %c0_30] : memref<32x32xf32, #tpu.memory_space<vmem>>, vector<8x32xf32>
    %cst_31 = arith.constant dense<0.000000e+00> : vector<16x32xf32>
    %78 = tpu.matmul %76, %77, %cst_31 {dimension_numbers = #tpu.dot_dimension_numbers<[1], [0], [0], [1], [0, 0, 1, 1], [], []>} : vector<16x8xf32>, vector<8x32xf32>, vector<16x32xf32> -> vector<16x32xf32>
    %79 = arith.addf %61, %78 : vector<16x32xf32>
    %c0_32 = arith.constant 0 : index
    %c0_33 = arith.constant 0 : index
    %80 = vector.load %arg5[%c0_32, %c0_33] : memref<1x32xf32, #tpu.memory_space<vmem>>, vector<1x32xf32>
    %81 = vector.broadcast %80 : vector<1x32xf32> to vector<16x32xf32>
    %82 = arith.addf %79, %81 : vector<16x32xf32>
    %83 = arith.addf %1, %82 : vector<16x32xf32>
    %c0_34 = arith.constant 0 : index
    %c0_35 = arith.constant 0 : index
    %84 = vector.load %arg6[%c0_34, %c0_35] : memref<1x32xf32, #tpu.memory_space<vmem>>, vector<1x32xf32>
    %85 = vector.broadcast %84 : vector<1x32xf32> to vector<16x32xf32>
    %86 = arith.mulf %83, %85 : vector<16x32xf32>
    %c0_36 = arith.constant 0 : index
    %c0_37 = arith.constant 0 : index
    %87 = vector.load %arg7[%c0_36, %c0_37] : memref<1x32xf32, #tpu.memory_space<vmem>>, vector<1x32xf32>
    %88 = vector.broadcast %87 : vector<1x32xf32> to vector<16x32xf32>
    %89 = arith.addf %86, %88 : vector<16x32xf32>
    %cst_38 = arith.constant 0.000000e+00 : f32
    %90 = vector.broadcast %cst_38 : f32 to vector<16x32xf32>
    %c0_39 = arith.constant 0 : index
    %c0_40 = arith.constant 0 : index
    %91 = vector.load %arg8[%c0_39, %c0_40] : memref<32x64xf32, #tpu.memory_space<vmem>>, vector<32x64xf32>
    %cst_41 = arith.constant dense<0.000000e+00> : vector<16x64xf32>
    %92 = tpu.matmul %89, %91, %cst_41 {dimension_numbers = #tpu.dot_dimension_numbers<[1], [0], [0], [1], [0, 0, 1, 1], [], []>} : vector<16x32xf32>, vector<32x64xf32>, vector<16x64xf32> -> vector<16x64xf32>
    %c0_42 = arith.constant 0 : index
    %c0_43 = arith.constant 0 : index
    %93 = vector.load %arg9[%c0_42, %c0_43] : memref<1x64xf32, #tpu.memory_space<vmem>>, vector<1x64xf32>
    %94 = vector.broadcast %93 : vector<1x64xf32> to vector<16x64xf32>
    %95 = arith.addf %92, %94 : vector<16x64xf32>
    %cst_44 = arith.constant 5.000000e-01 : f32
    %96 = vector.broadcast %cst_44 : f32 to vector<16x64xf32>
    %97 = arith.mulf %96, %95 : vector<16x64xf32>
    %cst_45 = arith.constant 4.471500e-02 : f32
    %98 = vector.broadcast %cst_45 : f32 to vector<16x64xf32>
    %99 = arith.mulf %98, %95 : vector<16x64xf32>
    %100 = arith.mulf %99, %95 : vector<16x64xf32>
    %101 = arith.mulf %100, %95 : vector<16x64xf32>
    %102 = arith.addf %95, %101 : vector<16x64xf32>
    %cst_46 = arith.constant 0.797884583 : f32
    %103 = vector.broadcast %cst_46 : f32 to vector<16x64xf32>
    %104 = arith.mulf %103, %102 : vector<16x64xf32>
    %105 = math.tanh %104 : vector<16x64xf32>
    %cst_47 = arith.constant 1.000000e+00 : f32
    %106 = vector.broadcast %cst_47 : f32 to vector<16x64xf32>
    %107 = arith.addf %106, %105 : vector<16x64xf32>
    %108 = arith.mulf %97, %107 : vector<16x64xf32>
    %c0_48 = arith.constant 0 : index
    %c0_49 = arith.constant 0 : index
    %109 = vector.load %arg10[%c0_48, %c0_49] : memref<64x32xf32, #tpu.memory_space<vmem>>, vector<64x32xf32>
    %cst_50 = arith.constant dense<0.000000e+00> : vector<16x32xf32>
    %110 = tpu.matmul %108, %109, %cst_50 {dimension_numbers = #tpu.dot_dimension_numbers<[1], [0], [0], [1], [0, 0, 1, 1], [], []>} : vector<16x64xf32>, vector<64x32xf32>, vector<16x32xf32> -> vector<16x32xf32>
    %111 = arith.addf %90, %110 : vector<16x32xf32>
    %c0_51 = arith.constant 0 : index
    %c0_52 = arith.constant 0 : index
    %112 = vector.load %arg11[%c0_51, %c0_52] : memref<1x32xf32, #tpu.memory_space<vmem>>, vector<1x32xf32>
    %113 = vector.broadcast %112 : vector<1x32xf32> to vector<16x32xf32>
    %114 = arith.addf %111, %113 : vector<16x32xf32>
    %115 = arith.addf %89, %114 : vector<16x32xf32>
    %c0_53 = arith.constant 0 : index
    %c0_54 = arith.constant 0 : index
    %116 = vector.load %arg12[%c0_53, %c0_54] : memref<1x32xf32, #tpu.memory_space<vmem>>, vector<1x32xf32>
    %117 = vector.broadcast %116 : vector<1x32xf32> to vector<16x32xf32>
    %118 = arith.mulf %115, %117 : vector<16x32xf32>
    %c0_55 = arith.constant 0 : index
    %c0_56 = arith.constant 0 : index
    %119 = vector.load %arg13[%c0_55, %c0_56] : memref<1x32xf32, #tpu.memory_space<vmem>>, vector<1x32xf32>
    %120 = vector.broadcast %119 : vector<1x32xf32> to vector<16x32xf32>
    %121 = arith.addf %118, %120 : vector<16x32xf32>
    %122 = vector.shape_cast %121 : vector<16x32xf32> to vector<1x16x32xf32>
    %c0_57 = arith.constant 0 : index
    %c0_58 = arith.constant 0 : index
    %c0_59 = arith.constant 0 : index
    %123 = vector.load %arg14[%c0_57, %c0_58, %c0_59] : memref<1x16x32xf32, #tpu.memory_space<vmem>>, vector<1x16x32xf32>
    tpu.vector_store %arg14[%c0_57, %c0_58, %c0_59], %122 {strides = array<i32>} : memref<1x16x32xf32, #tpu.memory_space<vmem>>, vector<1x16x32xf32>,
    return
  }
  func.func @transform_0(%arg0: i32) -> (i32, i32, i32) {
    %c0_i32 = arith.constant 0 : i32
    %c0_i32_0 = arith.constant 0 : i32
    %c0_i32_1 = arith.constant 0 : i32
    return %arg0, %c0_i32, %c0_i32_0 : i32, i32, i32
  }
  func.func @transform_1(%arg0: i32) -> (i32, i32) {
    %c0_i32 = arith.constant 0 : i32
    %c0_i32_0 = arith.constant 0 : i32
    %c0_i32_1 = arith.constant 0 : i32
    return %c0_i32, %c0_i32_0 : i32, i32
  }
  func.func @transform_2(%arg0: i32) -> (i32, i32) {
    %c0_i32 = arith.constant 0 : i32
    %c0_i32_0 = arith.constant 0 : i32
    %c0_i32_1 = arith.constant 0 : i32
    return %c0_i32, %c0_i32_0 : i32, i32
  }
  func.func @transform_3(%arg0: i32) -> (i32, i32) {
    %c0_i32 = arith.constant 0 : i32
    %c0_i32_0 = arith.constant 0 : i32
    %c0_i32_1 = arith.constant 0 : i32
    return %c0_i32, %c0_i32_0 : i32, i32
  }
  func.func @transform_4(%arg0: i32) -> (i32, i32) {
    %c0_i32 = arith.constant 0 : i32
    %c0_i32_0 = arith.constant 0 : i32
    %c0_i32_1 = arith.constant 0 : i32
    return %c0_i32, %c0_i32_0 : i32, i32
  }
  func.func @transform_5(%arg0: i32) -> (i32, i32) {
    %c0_i32 = arith.constant 0 : i32
    %c0_i32_0 = arith.constant 0 : i32
    %c0_i32_1 = arith.constant 0 : i32
    return %c0_i32, %c0_i32_0 : i32, i32
  }
  func.func @transform_6(%arg0: i32) -> (i32, i32) {
    %c0_i32 = arith.constant 0 : i32
    %c0_i32_0 = arith.constant 0 : i32
    %c0_i32_1 = arith.constant 0 : i32
    return %c0_i32, %c0_i32_0 : i32, i32
  }
  func.func @transform_7(%arg0: i32) -> (i32, i32) {
    %c0_i32 = arith.constant 0 : i32
    %c0_i32_0 = arith.constant 0 : i32
    %c0_i32_1 = arith.constant 0 : i32
    return %c0_i32, %c0_i32_0 : i32, i32
  }
  func.func @transform_8(%arg0: i32) -> (i32, i32) {
    %c0_i32 = arith.constant 0 : i32
    %c0_i32_0 = arith.constant 0 : i32
    %c0_i32_1 = arith.constant 0 : i32
    return %c0_i32, %c0_i32_0 : i32, i32
  }
  func.func @transform_9(%arg0: i32) -> (i32, i32) {
    %c0_i32 = arith.constant 0 : i32
    %c0_i32_0 = arith.constant 0 : i32
    %c0_i32_1 = arith.constant 0 : i32
    return %c0_i32, %c0_i32_0 : i32, i32
  }
  func.func @transform_10(%arg0: i32) -> (i32, i32) {
    %c0_i32 = arith.constant 0 : i32
    %c0_i32_0 = arith.constant 0 : i32
    %c0_i32_1 = arith.constant 0 : i32
    return %c0_i32, %c0_i32_0 : i32, i32
  }
  func.func @transform_11(%arg0: i32) -> (i32, i32) {
    %c0_i32 = arith.constant 0 : i32
    %c0_i32_0 = arith.constant 0 : i32
    %c0_i32_1 = arith.constant 0 : i32
    return %c0_i32, %c0_i32_0 : i32, i32
  }
  func.func @transform_12(%arg0: i32) -> (i32, i32) {
    %c0_i32 = arith.constant 0 : i32
    %c0_i32_0 = arith.constant 0 : i32
    %c0_i32_1 = arith.constant 0 : i32
    return %c0_i32, %c0_i32_0 : i32, i32
  }
  func.func @transform_13(%arg0: i32) -> (i32, i32, i32) {
    %c0_i32 = arith.constant 0 : i32
    %c0_i32_0 = arith.constant 0 : i32
    %c0_i32_1 = arith.constant 0 : i32
    return %arg0, %c0_i32, %c0_i32_0 : i32, i32, i32
  }
}

module attributes {stable_mosaic.version = 11 : i64} {
  func.func @_encoder_layer_kernel(%arg0: i32, %arg1: memref<1x16x32xf32, #tpu.memory_space<vmem>>, %arg2: memref<32x96xf32, #tpu.memory_space<vmem>>, %arg3: memref<1x96xf32, #tpu.memory_space<vmem>>, %arg4: memref<32x32xf32, #tpu.memory_space<vmem>>, %arg5: memref<1x32xf32, #tpu.memory_space<vmem>>, %arg6: memref<1x32xf32, #tpu.memory_space<vmem>>, %arg7: memref<1x32xf32, #tpu.memory_space<vmem>>, %arg8: memref<32x64xf32, #tpu.memory_space<vmem>>, %arg9: memref<1x64xf32, #tpu.memory_space<vmem>>, %arg10: memref<64x32xf32, #tpu.memory_space<vmem>>, %arg11: memref<1x32xf32, #tpu.memory_space<vmem>>, %arg12: memref<1x32xf32, #tpu.memory_space<vmem>>, %arg13: memref<1x32xf32, #tpu.memory_space<vmem>>, %arg14: memref<1x16x32xf32, #tpu.memory_space<vmem>>) attributes {dimension_semantics = [#tpu.dimension_semantics<parallel>], iteration_bounds = array<i64: 2>, scalar_prefetch = 0 : i64, scratch_operands = 0 : i64, tpu.core_type = #tpu.core_type<tc>, window_params = [{transform_indices = @transform_0, window_bounds = array<i64: 1, 16, 32>}, {pipeline_mode = #tpu.pipeline_mode<synchronous>, transform_indices = @transform_1, window_bounds = array<i64: 32, 96>}, {pipeline_mode = #tpu.pipeline_mode<synchronous>, transform_indices = @transform_2, window_bounds = array<i64: 1, 96>}, {pipeline_mode = #tpu.pipeline_mode<synchronous>, transform_indices = @transform_3, window_bounds = array<i64: 32, 32>}, {pipeline_mode = #tpu.pipeline_mode<synchronous>, transform_indices = @transform_4, window_bounds = array<i64: 1, 32>}, {pipeline_mode = #tpu.pipeline_mode<synchronous>, transform_indices = @transform_5, window_bounds = array<i64: 1, 32>}, {pipeline_mode = #tpu.pipeline_mode<synchronous>, transform_indices = @transform_6, window_bounds = array<i64: 1, 32>}, {pipeline_mode = #tpu.pipeline_mode<synchronous>, transform_indices = @transform_7, window_bounds = array<i64: 32, 64>}, {pipeline_mode = #tpu.pipeline_mode<synchronous>, transform_indices = @transform_8, window_bounds = array<i64: 1, 64>}, {pipeline_mode = #tpu.pipeline_mode<synchronous>, transform_indices = @transform_9, window_bounds = array<i64: 64, 32>}, {pipeline_mode = #tpu.pipeline_mode<synchronous>, transform_indices = @transform_10, window_bounds = array<i64: 1, 32>}, {pipeline_mode = #tpu.pipeline_mode<synchronous>, transform_indices = @transform_11, window_bounds = array<i64: 1, 32>}, {pipeline_mode = #tpu.pipeline_mode<synchronous>, transform_indices = @transform_12, window_bounds = array<i64: 1, 32>}, {transform_indices = @transform_13, window_bounds = array<i64: 1, 16, 32>}]} {
    %c0 = arith.constant 0 : index
    %c0_0 = arith.constant 0 : index
    %c0_1 = arith.constant 0 : index
    %0 = vector.load %arg1[%c0, %c0_0, %c0_1] : memref<1x16x32xf32, #tpu.memory_space<vmem>>, vector<1x16x32xf32>
    %1 = vector.shape_cast %0 : vector<1x16x32xf32> to vector<16x32xf32>
    %c0_2 = arith.constant 0 : index
    %c0_3 = arith.constant 0 : index
    %2 = vector.load %arg2[%c0_2, %c0_3] : memref<32x96xf32, #tpu.memory_space<vmem>>, vector<32x96xf32>
    %cst = arith.constant dense<0.000000e+00> : vector<16x96xf32>
    %3 = tpu.matmul %1, %2, %cst {dimension_numbers = #tpu.dot_dimension_numbers<[1], [0], [0], [1], [0, 0, 1, 1], [], []>} : vector<16x32xf32>, vector<32x96xf32>, vector<16x96xf32> -> vector<16x96xf32>
    %c0_4 = arith.constant 0 : index
    %c0_5 = arith.constant 0 : index
    %4 = vector.load %arg3[%c0_4, %c0_5] : memref<1x96xf32, #tpu.memory_space<vmem>>, vector<1x96xf32>
    %5 = vector.broadcast %4 : vector<1x96xf32> to vector<16x96xf32>
    %6 = arith.addf %3, %5 : vector<16x96xf32>
    %cst_6 = arith.constant 0.000000e+00 : f32
    %7 = vector.broadcast %cst_6 : f32 to vector<16x32xf32>
    %8 = vector.extract_strided_slice %6 {offsets = [0, 0], sizes = [16, 8], strides = [1, 1]} : vector<16x96xf32> to vector<16x8xf32>
    %9 = vector.extract_strided_slice %6 {offsets = [0, 32], sizes = [16, 8], strides = [1, 1]} : vector<16x96xf32> to vector<16x8xf32>
    %10 = vector.extract_strided_slice %6 {offsets = [0, 64], sizes = [16, 8], strides = [1, 1]} : vector<16x96xf32> to vector<16x8xf32>
    "tpu.trace_start"() <{level = 10 : i32, message = "le,se->ls"}> : () -> ()
    %cst_7 = arith.constant dense<0.000000e+00> : vector<16x16xf32>
    %11 = tpu.matmul %8, %9, %cst_7 {dimension_numbers = #tpu.dot_dimension_numbers<[1], [1], [0], [0], [0, 0, 1, 0], [], []>} : vector<16x8xf32>, vector<16x8xf32>, vector<16x16xf32> -> vector<16x16xf32>
    "tpu.trace_stop"() : () -> ()
    %cst_8 = arith.constant dense<0xFF800000> : vector<16xf32>
    %12 = vector.multi_reduction <maximumf>, %11, %cst_8 [1] : vector<16x16xf32> to vector<16xf32>
    %13 = vector.shape_cast %12 : vector<16xf32> to vector<16x1xf32>
    %14 = vector.broadcast %13 : vector<16x1xf32> to vector<16x16xf32>
    %15 = arith.subf %11, %14 : vector<16x16xf32>
    %16 = math.exp %15 : vector<16x16xf32>
    %cst_9 = arith.constant dense<0.000000e+00> : vector<16xf32>
    %17 = vector.multi_reduction <add>, %16, %cst_9 [1] : vector<16x16xf32> to vector<16xf32>
    %18 = vector.shape_cast %17 : vector<16xf32> to vector<16x1xf32>
    %cst_10 = arith.constant dense<0.000000e+00> : vector<16x8xf32>
    %19 = tpu.matmul %16, %10, %cst_10 {dimension_numbers = #tpu.dot_dimension_numbers<[1], [0], [0], [1], [0, 0, 1, 1], [], []>} : vector<16x16xf32>, vector<16x8xf32>, vector<16x8xf32> -> vector<16x8xf32>
    %20 = tpu.reciprocal %18 : vector<16x1xf32> -> vector<16x1xf32>
    %21 = vector.broadcast %20 : vector<16x1xf32> to vector<16x8xf32>
    %22 = arith.mulf %19, %21 : vector<16x8xf32>
    %c0_11 = arith.constant 0 : index
    %c0_12 = arith.constant 0 : index
    %23 = vector.load %arg4[%c0_11, %c0_12] : memref<32x32xf32, #tpu.memory_space<vmem>>, vector<8x32xf32>
    %cst_13 = arith.constant dense<0.000000e+00> : vector<16x32xf32>
    %24 = tpu.matmul %22, %23, %cst_13 {dimension_numbers = #tpu.dot_dimension_numbers<[1], [0], [0], [1], [0, 0, 1, 1], [], []>} : vector<16x8xf32>, vector<8x32xf32>, vector<16x32xf32> -> vector<16x32xf32>
    %25 = arith.addf %7, %24 : vector<16x32xf32>
    %26 = vector.extract_strided_slice %6 {offsets = [0, 8], sizes = [16, 8], strides = [1, 1]} : vector<16x96xf32> to vector<16x8xf32>
    %27 = vector.extract_strided_slice %6 {offsets = [0, 40], sizes = [16, 8], strides = [1, 1]} : vector<16x96xf32> to vector<16x8xf32>
    %28 = vector.extract_strided_slice %6 {offsets = [0, 72], sizes = [16, 8], strides = [1, 1]} : vector<16x96xf32> to vector<16x8xf32>
    "tpu.trace_start"() <{level = 10 : i32, message = "le,se->ls"}> : () -> ()
    %cst_14 = arith.constant dense<0.000000e+00> : vector<16x16xf32>
    %29 = tpu.matmul %26, %27, %cst_14 {dimension_numbers = #tpu.dot_dimension_numbers<[1], [1], [0], [0], [0, 0, 1, 0], [], []>} : vector<16x8xf32>, vector<16x8xf32>, vector<16x16xf32> -> vector<16x16xf32>
    "tpu.trace_stop"() : () -> ()
    %cst_15 = arith.constant dense<0xFF800000> : vector<16xf32>
    %30 = vector.multi_reduction <maximumf>, %29, %cst_15 [1] : vector<16x16xf32> to vector<16xf32>
    %31 = vector.shape_cast %30 : vector<16xf32> to vector<16x1xf32>
    %32 = vector.broadcast %31 : vector<16x1xf32> to vector<16x16xf32>
    %33 = arith.subf %29, %32 : vector<16x16xf32>
    %34 = math.exp %33 : vector<16x16xf32>
    %cst_16 = arith.constant dense<0.000000e+00> : vector<16xf32>
    %35 = vector.multi_reduction <add>, %34, %cst_16 [1] : vector<16x16xf32> to vector<16xf32>
    %36 = vector.shape_cast %35 : vector<16xf32> to vector<16x1xf32>
    %cst_17 = arith.constant dense<0.000000e+00> : vector<16x8xf32>
    %37 = tpu.matmul %34, %28, %cst_17 {dimension_numbers = #tpu.dot_dimension_numbers<[1], [0], [0], [1], [0, 0, 1, 1], [], []>} : vector<16x16xf32>, vector<16x8xf32>, vector<16x8xf32> -> vector<16x8xf32>
    %38 = tpu.reciprocal %36 : vector<16x1xf32> -> vector<16x1xf32>
    %39 = vector.broadcast %38 : vector<16x1xf32> to vector<16x8xf32>
    %40 = arith.mulf %37, %39 : vector<16x8xf32>
    %c8 = arith.constant 8 : index
    %c0_18 = arith.constant 0 : index
    %41 = vector.load %arg4[%c8, %c0_18] : memref<32x32xf32, #tpu.memory_space<vmem>>, vector<8x32xf32>
    %cst_19 = arith.constant dense<0.000000e+00> : vector<16x32xf32>
    %42 = tpu.matmul %40, %41, %cst_19 {dimension_numbers = #tpu.dot_dimension_numbers<[1], [0], [0], [1], [0, 0, 1, 1], [], []>} : vector<16x8xf32>, vector<8x32xf32>, vector<16x32xf32> -> vector<16x32xf32>
    %43 = arith.addf %25, %42 : vector<16x32xf32>
    %44 = vector.extract_strided_slice %6 {offsets = [0, 16], sizes = [16, 8], strides = [1, 1]} : vector<16x96xf32> to vector<16x8xf32>
    %45 = vector.extract_strided_slice %6 {offsets = [0, 48], sizes = [16, 8], strides = [1, 1]} : vector<16x96xf32> to vector<16x8xf32>
    %46 = vector.extract_strided_slice %6 {offsets = [0, 80], sizes = [16, 8], strides = [1, 1]} : vector<16x96xf32> to vector<16x8xf32>
    "tpu.trace_start"() <{level = 10 : i32, message = "le,se->ls"}> : () -> ()
    %cst_20 = arith.constant dense<0.000000e+00> : vector<16x16xf32>
    %47 = tpu.matmul %44, %45, %cst_20 {dimension_numbers = #tpu.dot_dimension_numbers<[1], [1], [0], [0], [0, 0, 1, 0], [], []>} : vector<16x8xf32>, vector<16x8xf32>, vector<16x16xf32> -> vector<16x16xf32>
    "tpu.trace_stop"() : () -> ()
    %cst_21 = arith.constant dense<0xFF800000> : vector<16xf32>
    %48 = vector.multi_reduction <maximumf>, %47, %cst_21 [1] : vector<16x16xf32> to vector<16xf32>
    %49 = vector.shape_cast %48 : vector<16xf32> to vector<16x1xf32>
    %50 = vector.broadcast %49 : vector<16x1xf32> to vector<16x16xf32>
    %51 = arith.subf %47, %50 : vector<16x16xf32>
    %52 = math.exp %51 : vector<16x16xf32>
    %cst_22 = arith.constant dense<0.000000e+00> : vector<16xf32>
    %53 = vector.multi_reduction <add>, %52, %cst_22 [1] : vector<16x16xf32> to vector<16xf32>
    %54 = vector.shape_cast %53 : vector<16xf32> to vector<16x1xf32>
    %cst_23 = arith.constant dense<0.000000e+00> : vector<16x8xf32>
    %55 = tpu.matmul %52, %46, %cst_23 {dimension_numbers = #tpu.dot_dimension_numbers<[1], [0], [0], [1], [0, 0, 1, 1], [], []>} : vector<16x16xf32>, vector<16x8xf32>, vector<16x8xf32> -> vector<16x8xf32>
    %56 = tpu.reciprocal %54 : vector<16x1xf32> -> vector<16x1xf32>
    %57 = vector.broadcast %56 : vector<16x1xf32> to vector<16x8xf32>
    %58 = arith.mulf %55, %57 : vector<16x8xf32>
    %c16 = arith.constant 16 : index
    %c0_24 = arith.constant 0 : index
    %59 = vector.load %arg4[%c16, %c0_24] : memref<32x32xf32, #tpu.memory_space<vmem>>, vector<8x32xf32>
    %cst_25 = arith.constant dense<0.000000e+00> : vector<16x32xf32>
    %60 = tpu.matmul %58, %59, %cst_25 {dimension_numbers = #tpu.dot_dimension_numbers<[1], [0], [0], [1], [0, 0, 1, 1], [], []>} : vector<16x8xf32>, vector<8x32xf32>, vector<16x32xf32> -> vector<16x32xf32>
    %61 = arith.addf %43, %60 : vector<16x32xf32>
    %62 = vector.extract_strided_slice %6 {offsets = [0, 24], sizes = [16, 8], strides = [1, 1]} : vector<16x96xf32> to vector<16x8xf32>
    %63 = vector.extract_strided_slice %6 {offsets = [0, 56], sizes = [16, 8], strides = [1, 1]} : vector<16x96xf32> to vector<16x8xf32>
    %64 = vector.extract_strided_slice %6 {offsets = [0, 88], sizes = [16, 8], strides = [1, 1]} : vector<16x96xf32> to vector<16x8xf32>
    "tpu.trace_start"() <{level = 10 : i32, message = "le,se->ls"}> : () -> ()
    %cst_26 = arith.constant dense<0.000000e+00> : vector<16x16xf32>
    %65 = tpu.matmul %62, %63, %cst_26 {dimension_numbers = #tpu.dot_dimension_numbers<[1], [1], [0], [0], [0, 0, 1, 0], [], []>} : vector<16x8xf32>, vector<16x8xf32>, vector<16x16xf32> -> vector<16x16xf32>
    "tpu.trace_stop"() : () -> ()
    %cst_27 = arith.constant dense<0xFF800000> : vector<16xf32>
    %66 = vector.multi_reduction <maximumf>, %65, %cst_27 [1] : vector<16x16xf32> to vector<16xf32>
    %67 = vector.shape_cast %66 : vector<16xf32> to vector<16x1xf32>
    %68 = vector.broadcast %67 : vector<16x1xf32> to vector<16x16xf32>
    %69 = arith.subf %65, %68 : vector<16x16xf32>
    %70 = math.exp %69 : vector<16x16xf32>
    %cst_28 = arith.constant dense<0.000000e+00> : vector<16xf32>
    %71 = vector.multi_reduction <add>, %70, %cst_28 [1] : vector<16x16xf32> to vector<16xf32>
    %72 = vector.shape_cast %71 : vector<16xf32> to vector<16x1xf32>
    %cst_29 = arith.constant dense<0.000000e+00> : vector<16x8xf32>
    %73 = tpu.matmul %70, %64, %cst_29 {dimension_numbers = #tpu.dot_dimension_numbers<[1], [0], [0], [1], [0, 0, 1, 1], [], []>} : vector<16x16xf32>, vector<16x8xf32>, vector<16x8xf32> -> vector<16x8xf32>
    %74 = tpu.reciprocal %72 : vector<16x1xf32> -> vector<16x1xf32>
    %75 = vector.broadcast %74 : vector<16x1xf32> to vector<16x8xf32>
    %76 = arith.mulf %73, %75 : vector<16x8xf32>
    %c24 = arith.constant 24 : index
    %c0_30 = arith.constant 0 : index
    %77 = vector.load %arg4[%c24, %c0_30] : memref<32x32xf32, #tpu.memory_space<vmem>>, vector<8x32xf32>
    %cst_31 = arith.constant dense<0.000000e+00> : vector<16x32xf32>
    %78 = tpu.matmul %76, %77, %cst_31 {dimension_numbers = #tpu.dot_dimension_numbers<[1], [0], [0], [1], [0, 0, 1, 1], [], []>} : vector<16x8xf32>, vector<8x32xf32>, vector<16x32xf32> -> vector<16x32xf32>
    %79 = arith.addf %61, %78 : vector<16x32xf32>
    %c0_32 = arith.constant 0 : index
    %c0_33 = arith.constant 0 : index
    %80 = vector.load %arg5[%c0_32, %c0_33] : memref<1x32xf32, #tpu.memory_space<vmem>>, vector<1x32xf32>
    %81 = vector.broadcast %80 : vector<1x32xf32> to vector<16x32xf32>
    %82 = arith.addf %79, %81 : vector<16x32xf32>
    %83 = arith.addf %1, %82 : vector<16x32xf32>
    %c0_34 = arith.constant 0 : index
    %c0_35 = arith.constant 0 : index
    %84 = vector.load %arg6[%c0_34, %c0_35] : memref<1x32xf32, #tpu.memory_space<vmem>>, vector<1x32xf32>
    %85 = vector.broadcast %84 : vector<1x32xf32> to vector<16x32xf32>
    %86 = arith.mulf %83, %85 : vector<16x32xf32>
    %c0_36 = arith.constant 0 : index
    %c0_37 = arith.constant 0 : index
    %87 = vector.load %arg7[%c0_36, %c0_37] : memref<1x32xf32, #tpu.memory_space<vmem>>, vector<1x32xf32>
    %88 = vector.broadcast %87 : vector<1x32xf32> to vector<16x32xf32>
    %89 = arith.addf %86, %88 : vector<16x32xf32>
    %cst_38 = arith.constant 0.000000e+00 : f32
    %90 = vector.broadcast %cst_38 : f32 to vector<16x32xf32>
    %c0_39 = arith.constant 0 : index
    %c0_40 = arith.constant 0 : index
    %91 = vector.load %arg8[%c0_39, %c0_40] : memref<32x64xf32, #tpu.memory_space<vmem>>, vector<32x64xf32>
    %cst_41 = arith.constant dense<0.000000e+00> : vector<16x64xf32>
    %92 = tpu.matmul %89, %91, %cst_41 {dimension_numbers = #tpu.dot_dimension_numbers<[1], [0], [0], [1], [0, 0, 1, 1], [], []>} : vector<16x32xf32>, vector<32x64xf32>, vector<16x64xf32> -> vector<16x64xf32>
    %c0_42 = arith.constant 0 : index
    %c0_43 = arith.constant 0 : index
    %93 = vector.load %arg9[%c0_42, %c0_43] : memref<1x64xf32, #tpu.memory_space<vmem>>, vector<1x64xf32>
    %94 = vector.broadcast %93 : vector<1x64xf32> to vector<16x64xf32>
    %95 = arith.addf %92, %94 : vector<16x64xf32>
    %cst_44 = arith.constant 5.000000e-01 : f32
    %96 = vector.broadcast %cst_44 : f32 to vector<16x64xf32>
    %97 = arith.mulf %96, %95 : vector<16x64xf32>
    %cst_45 = arith.constant 4.471500e-02 : f32
    %98 = vector.broadcast %cst_45 : f32 to vector<16x64xf32>
    %99 = arith.mulf %98, %95 : vector<16x64xf32>
    %100 = arith.mulf %99, %95 : vector<16x64xf32>
    %101 = arith.mulf %100, %95 : vector<16x64xf32>
    %102 = arith.addf %95, %101 : vector<16x64xf32>
    %cst_46 = arith.constant 0.797884583 : f32
    %103 = vector.broadcast %cst_46 : f32 to vector<16x64xf32>
    %104 = arith.mulf %103, %102 : vector<16x64xf32>
    %105 = math.tanh %104 : vector<16x64xf32>
    %cst_47 = arith.constant 1.000000e+00 : f32
    %106 = vector.broadcast %cst_47 : f32 to vector<16x64xf32>
    %107 = arith.addf %106, %105 : vector<16x64xf32>
    %108 = arith.mulf %97, %107 : vector<16x64xf32>
    %c0_48 = arith.constant 0 : index
    %c0_49 = arith.constant 0 : index
    %109 = vector.load %arg10[%c0_48, %c0_49] : memref<64x32xf32, #tpu.memory_space<vmem>>, vector<64x32xf32>
    %cst_50 = arith.constant dense<0.000000e+00> : vector<16x32xf32>
    %110 = tpu.matmul %108, %109, %cst_50 {dimension_numbers = #tpu.dot_dimension_numbers<[1], [0], [0], [1], [0, 0, 1, 1], [], []>} : vector<16x64xf32>, vector<64x32xf32>, vector<16x32xf32> -> vector<16x32xf32>
    %111 = arith.addf %90, %110 : vector<16x32xf32>
    %c0_51 = arith.constant 0 : index
    %c0_52 = arith.constant 0 : index
    %112 = vector.load %arg11[%c0_51, %c0_52] : memref<1x32xf32, #tpu.memory_space<vmem>>, vector<1x32xf32>
    %113 = vector.broadcast %112 : vector<1x32xf32> to vector<16x32xf32>
    %114 = arith.addf %111, %113 : vector<16x32xf32>
    %115 = arith.addf %89, %114 : vector<16x32xf32>
    %c0_53 = arith.constant 0 : index
    %c0_54 = arith.constant 0 : index
    %116 = vector.load %arg12[%c0_53, %c0_54] : memref<1x32xf32, #tpu.memory_space<vmem>>, vector<1x32xf32>
    %117 = vector.broadcast %116 : vector<1x32xf32> to vector<16x32xf32>
    %118 = arith.mulf %115, %117 : vector<16x32xf32>
    %c0_55 = arith.constant 0 : index
    %c0_56 = arith.constant 0 : index
    %119 = vector.load %arg13[%c0_55, %c0_56] : memref<1x32xf32, #tpu.memory_space<vmem>>, vector<1x32xf32>
    %120 = vector.broadcast %119 : vector<1x32xf32> to vector<16x32xf32>
    %121 = arith.addf %118, %120 : vector<16x32xf32>
    %122 = vector.shape_cast %121 : vector<16x32xf32> to vector<1x16x32xf32>
    %c0_57 = arith.constant 0 : index
    %c0_58 = arith.constant 0 : index
    %c0_59 = arith.constant 0 : index
    %123 = vector.load %arg14[%c0_57, %c0_58, %c0_59] : memref<1x16x32xf32, #tpu.memory_space<vmem>>, vector<1x16x32xf32>
    tpu.vector_store %arg14[%c0_57, %c0_58, %c0_59], %122 {strides = array<i32>} : memref<1x16x32xf32, #tpu.memory_space<vmem>>, vector<1x16x32xf32>,
    return
  }
  func.func @transform_0(%arg0: i32) -> (i32, i32, i32) {
    %c0_i32 = arith.constant 0 : i32
    %c0_i32_0 = arith.constant 0 : i32
    %c0_i32_1 = arith.constant 0 : i32
    return %arg0, %c0_i32, %c0_i32_0 : i32, i32, i32
  }
  func.func @transform_1(%arg0: i32) -> (i32, i32) {
    %c0_i32 = arith.constant 0 : i32
    %c0_i32_0 = arith.constant 0 : i32
    %c0_i32_1 = arith.constant 0 : i32
    return %c0_i32, %c0_i32_0 : i32, i32
  }
  func.func @transform_2(%arg0: i32) -> (i32, i32) {
    %c0_i32 = arith.constant 0 : i32
    %c0_i32_0 = arith.constant 0 : i32
    %c0_i32_1 = arith.constant 0 : i32
    return %c0_i32, %c0_i32_0 : i32, i32
  }
  func.func @transform_3(%arg0: i32) -> (i32, i32) {
    %c0_i32 = arith.constant 0 : i32
    %c0_i32_0 = arith.constant 0 : i32
    %c0_i32_1 = arith.constant 0 : i32
    return %c0_i32, %c0_i32_0 : i32, i32
  }
  func.func @transform_4(%arg0: i32) -> (i32, i32) {
    %c0_i32 = arith.constant 0 : i32
    %c0_i32_0 = arith.constant 0 : i32
    %c0_i32_1 = arith.constant 0 : i32
    return %c0_i32, %c0_i32_0 : i32, i32
  }
  func.func @transform_5(%arg0: i32) -> (i32, i32) {
    %c0_i32 = arith.constant 0 : i32
    %c0_i32_0 = arith.constant 0 : i32
    %c0_i32_1 = arith.constant 0 : i32
    return %c0_i32, %c0_i32_0 : i32, i32
  }
  func.func @transform_6(%arg0: i32) -> (i32, i32) {
    %c0_i32 = arith.constant 0 : i32
    %c0_i32_0 = arith.constant 0 : i32
    %c0_i32_1 = arith.constant 0 : i32
    return %c0_i32, %c0_i32_0 : i32, i32
  }
  func.func @transform_7(%arg0: i32) -> (i32, i32) {
    %c0_i32 = arith.constant 0 : i32
    %c0_i32_0 = arith.constant 0 : i32
    %c0_i32_1 = arith.constant 0 : i32
    return %c0_i32, %c0_i32_0 : i32, i32
  }
  func.func @transform_8(%arg0: i32) -> (i32, i32) {
    %c0_i32 = arith.constant 0 : i32
    %c0_i32_0 = arith.constant 0 : i32
    %c0_i32_1 = arith.constant 0 : i32
    return %c0_i32, %c0_i32_0 : i32, i32
  }
  func.func @transform_9(%arg0: i32) -> (i32, i32) {
    %c0_i32 = arith.constant 0 : i32
    %c0_i32_0 = arith.constant 0 : i32
    %c0_i32_1 = arith.constant 0 : i32
    return %c0_i32, %c0_i32_0 : i32, i32
  }
  func.func @transform_10(%arg0: i32) -> (i32, i32) {
    %c0_i32 = arith.constant 0 : i32
    %c0_i32_0 = arith.constant 0 : i32
    %c0_i32_1 = arith.constant 0 : i32
    return %c0_i32, %c0_i32_0 : i32, i32
  }
  func.func @transform_11(%arg0: i32) -> (i32, i32) {
    %c0_i32 = arith.constant 0 : i32
    %c0_i32_0 = arith.constant 0 : i32
    %c0_i32_1 = arith.constant 0 : i32
    return %c0_i32, %c0_i32_0 : i32, i32
  }
  func.func @transform_12(%arg0: i32) -> (i32, i32) {
    %c0_i32 = arith.constant 0 : i32
    %c0_i32_0 = arith.constant 0 : i32
    %c0_i32_1 = arith.constant 0 : i32
    return %c0_i32, %c0_i32_0 : i32, i32
  }
  func.func @transform_13(%arg0: i32) -> (i32, i32, i32) {
    %c0_i32 = arith.constant 0 : i32
    %c0_i32_0 = arith.constant 0 : i32
    %c0_i32_1 = arith.constant 0 : i32
    return %arg0, %c0_i32, %c0_i32_0 : i32, i32, i32
  }
}

</mosaic_0001>

<bundles_post_ra>
// kernel: tpu_custom_call.1
= control target key start
LH: loop header
LB: loop body
LE: loop exit
PB: predicated region body
PF: predicated region fallthrough
CT: control target
= control target key end

     0   :  { %s3266_s0 = inlined_call_operand.vmem [shape: f32[2,16,32], index: 0, kind: input, shape index: {}]   ;;  %s3267_s1 = inlined_call_operand.vmem [shape: f32[32,96], index: 1, kind: input, shape index: {}]   ;;  %s3268_s2 = inlined_call_operand.vmem [shape: f32[1,96], index: 2, kind: input, shape index: {}]   ;;  %s3269_s3 = inlined_call_operand.vmem [shape: f32[32,32], index: 3, kind: input, shape index: {}]   ;;  %s3270_s4 = inlined_call_operand.vmem [shape: f32[1,32], index: 4, kind: input, shape index: {}]   ;;  %s3271_s5 = inlined_call_operand.hbm [shape: f32[1,32], index: 5, kind: input, shape index: {}]   ;;  %s3272_s6 = inlined_call_operand.hbm [shape: f32[1,32], index: 6, kind: input, shape index: {}]   ;;  %s3273_s7 = inlined_call_operand.hbm [shape: f32[32,64], index: 7, kind: input, shape index: {}]   ;;  %s3274_s8 = inlined_call_operand.hbm [shape: f32[1,64], index: 8, kind: input, shape index: {}]   ;;  %s3275_s9 = inlined_call_operand.vmem [shape: f32[64,32], index: 9, kind: input, shape index: {}]   ;;  %s3276_s10 = inlined_call_operand.vmem [shape: f32[1,32], index: 10, kind: input, shape index: {}]   ;;  %s3277_s11 = inlined_call_operand.vmem [shape: f32[1,32], index: 11, kind: input, shape index: {}]   ;;  %s3278_s12 = inlined_call_operand.vmem [shape: f32[1,32], index: 12, kind: input, shape index: {}]   ;;  %s3279_s13 = inlined_call_operand.hbm [shape: f32[2,16,32], index: 13, kind: output, shape index: {}]  }
   0x1   :  { %3290 = sst [smem:[#allocation21_spill]] %s3271_s5 }
   0x2   :  { %3291 = sst [smem:[#allocation22_spill]] %s3272_s6 }
   0x3   :  { %3292 = sst [smem:[#allocation23_spill]] %s3279_s13 }
   0x4   :  { %18 = vsyncpa [#allocation3], 0 }
   0x5   :  { %19 = vsyncpa [#allocation6], 0 }
   0x6   :  { %20 = vsyncpa [#allocation9], 0 }
   0x7   :  { %21 = vsyncpa [#allocation4], 0 }
   0x8   :  { %23 = vsyncpa [#allocation4 + $0x1], 0  ;;  %s2872_s25 = smov 0   ;;  %s2874_s26 = smov 0  }
   0x9   :  { %s2876_s27 = smov 0   ;;  %s2878_s28 = smov 0  }
   0xa LB: > { %3293 = sst [smem:[#allocation15_spill]] %s2768_s25  ;;  %s2893_s29 = sadd.s32 4294967295, %s2780_s28   ;;  %s2780_s28 = sphi %s2878_s28, %s3321_s28   ;;  %s2776_s27 = sphi %s2876_s27, %s3323_s27   ;;  %s2772_s26 = sphi %s2874_s26, %s3325_s26   ;;  %s2768_s25 = sphi %s2872_s25, %s3324_s25  }
   0xb   : > { %3294 = sst [smem:[#allocation16_spill]] %s2776_s27  ;;  %s2094_s30 = sadd.s32 4294967294, %s2780_s28  }
   0xc   : > { %3295 = sst [smem:[#allocation17_spill]] %s2780_s28  ;;  %s2897_s14 = sadd.s32 1, %s2780_s28  }
   0xd   : > { %3296 = sst [smem:[#allocation18_spill]] %s2897_s14  ;;  %s314_s15 = sadd.s32 1, %s2776_s27 }
   0xe   : > { %s311_s16 = ssub.s32 %s2780_s28, %s2897_s14  ;;  %p324_p0 = scmp.ne.s32.totalorder %s2776_s27, %s2772_s26 }
   0xf   : > { %p312_p1 = scmp.eq.s32.totalorder %s311_s16, 0  ;;  %p325_p2 = scmp.eq.s32.totalorder %s2893_s29, 1 }
  0x10   : > { %p330_p3 = scmp.ne.s32.totalorder %s2772_s26, %s2768_s25  ;;  %p331_p4 = scmp.eq.s32.totalorder %s2094_s30, 1 }
  0x11   : > { %s2908_s17 = scalar_select %p312_p1, %s2776_s27, %s314_s15  }
  0x12   : > { %p2910_p5 = por %p325_p2, %p324_p0  ;;  %p2914_p6 = por %p331_p4, %p330_p3 }
  0x13   : > { %3297 = sst [smem:[#allocation19_spill]] %s2908_s17  ;;  %p2095_p7 = scmp.ge.s32.totalorder %s2780_s28, 1 }
  0x14   : > { %s3298_s18 = scalar_select %p2910_p5, 1, 0 }
  0x15   : > { %s3299_s19 = scalar_select %p2914_p6, 1, 0 }
  0x16   : > { %p338_p8 = scmp.lt.s32.totalorder %s2780_s28, 3  ;;  %p3285_p9 = scmp.eq.s32.totalorder %s2893_s29, 0 }
  0x17   : > { %3300 = sst [smem:[#allocation20_spill]] %s3299_s19  ;;  %s2782_s21 = smov [#allocation5]  }
  0x18   : > { %p2921_p10 = pnand %p2095_p7, %p338_p8  ;;  %s374_s22 = sshll.u32 %s2782_s21, 4  ;;  %s375_s22 = int_to_ptr.vmem [resolvable:$true] %s374_s22 }
  0x19   : > { %s2783_s23 = smov [#allocation2]   ;;  %s2784_s15 = smov [#allocation7]  }
  0x1a   : > { %s3301_s20 = scalar_select %p2921_p10, 1, 0 }
  0x1b   : > { %p2441_p11 = pneg %p2921_p10  ;;  %s363_s24 = sshll.u32 %s2783_s23, 4  ;;  %s2933_s24 = int_to_ptr.vmem [resolvable:$true] %s363_s24 }
  0x1c   : > { %s384_s16 = sshll.u32 %s2784_s15, 4  ;;  %s3303_s6 = sld [smem:[#allocation22_spill]]  ;;  %s2935_s16 = int_to_ptr.vmem [resolvable:$true] %s384_s16 }
  0x1d   : > { %p2929_p12 = pnand %p3285_p9, %p2441_p11 }
  0x1f   : > { %p2945_p0 = pneg %p2929_p12 }
  0x22   : > { %s2594_s21 = scalar_lea.hbm %s3303_s6, 16 }
  0x23   : > { %p2595_p13 = scmp.ne.s32.totalorder %s3303_s6, %s2594_s21  ;;  %p2601_p3 = scmp.lt.u32.totalorder %s2594_s21, %s3303_s6 }
  0x25   : > { %p2597_p1 = pnand %p2945_p0, %p2595_p13 }
  0x27   : > { %p2598_p2 = pneg %p2597_p1 }
  0x29   : > { %p2603_p4 = pnand %p2601_p3, %p2598_p2 }
  0x2b   : > { %2606 = shalt.err (!%p2603_p4)
}
  0x2c   : > { %s2607_s27 = scalar_lea.vmem %s375_s22, 16  ;;  %s2614_s14 = scalar_lea.vmem %s375_s22, 32 }
  0x2d   : > { %p2608_p7 = scmp.ne.s32.totalorder %s375_s22, %s2607_s27  ;;  %p2615_p9 = scmp.lt.s32.totalorder %s375_s22, %s375_s22 }
  0x2e   : > { %p2616_p6 = scmp.lt.s32.totalorder %s2614_s14, %s2607_s27 }
  0x2f   : > { %p2610_p8 = pnand %p2608_p7, %p2945_p0 }
  0x30   : > { %p2617_p5 = por %p2616_p6, %p2615_p9 }
  0x31   : > { %p2611_p11 = pneg %p2610_p8 }
  0x33   : > { %p2618_p10 = pnand %p2617_p5, %p2611_p11 }
  0x35   : > { %2621 = shalt.err (!%p2618_p10)
}
  0x36   : > { %2447 = dma.hbm_to_vmem [thread:$0]  (!%p2929_p12), %s3303_s6, 16, %s375_s22, [#allocation6]  }
  0x37   : > { %s3305_s5 = sld [smem:[#allocation21_spill]] }
  0x3d   : > { %s2622_s15 = scalar_lea.hbm %s3305_s5, 16 }
  0x3e   : > { %p2623_p13 = scmp.ne.s32.totalorder %s3305_s5, %s2622_s15  ;;  %p2629_p5 = scmp.lt.u32.totalorder %s2622_s15, %s3305_s5 }
  0x40   : > { %p2625_p1 = pnand %p2623_p13, %p2945_p0 }
  0x42   : > { %p2626_p6 = pneg %p2625_p1 }
  0x44   : > { %p2631_p9 = pnand %p2629_p5, %p2626_p6 }
  0x46   : > { %2634 = shalt.err (!%p2631_p9)
}
  0x47   : > { %s2635_s22 = scalar_lea.vmem %s2933_s24, 16  ;;  %s2642_s13 = scalar_lea.vmem %s2933_s24, 32 }
  0x48   : > { %p2636_p10 = scmp.ne.s32.totalorder %s2933_s24, %s2635_s22  ;;  %p2643_p4 = scmp.lt.s32.totalorder %s2933_s24, %s2933_s24 }
  0x49   : > { %p2644_p7 = scmp.lt.s32.totalorder %s2642_s13, %s2635_s22 }
  0x4a   : > { %p2638_p2 = pnand %p2636_p10, %p2945_p0 }
  0x4b   : > { %p2645_p8 = por %p2644_p7, %p2643_p4 }
  0x4c   : > { %p2639_p3 = pneg %p2638_p2 }
  0x4e   : > { %p2646_p11 = pnand %p2645_p8, %p2639_p3 }
  0x50   : > { %2649 = shalt.err (!%p2646_p11)
}
  0x51   : > { %2444 = dma.hbm_to_vmem [thread:$0]  (!%p2929_p12), %s3305_s5, 16, %s2933_s24, [#allocation3]  }
  0x52   : > { %s2650_s21 = scalar_lea.hbm %s3273_s7, 512 }
  0x53   : > { %p2651_p13 = scmp.ne.s32.totalorder %s3273_s7, %s2650_s21  ;;  %p2657_p5 = scmp.lt.u32.totalorder %s2650_s21, %s3273_s7 }
  0x55   : > { %p2653_p1 = pnand %p2651_p13, %p2945_p0 }
  0x57   : > { %p2654_p6 = pneg %p2653_p1 }
  0x59   : > { %p2659_p9 = pnand %p2657_p5, %p2654_p6 }
  0x5b   : > { %2662 = shalt.err (!%p2659_p9)
}
  0x5c   : > { %s2663_s24 = scalar_lea.vmem %s2935_s16, 512  ;;  %p2671_p4 = scmp.lt.s32.totalorder %s2935_s16, %s2935_s16 }
  0x5d   : > { %p2664_p10 = scmp.ne.s32.totalorder %s2935_s16, %s2663_s24  ;;  %p2672_p7 = scmp.lt.s32.totalorder %s2663_s24, %s2663_s24 }
  0x5f   : > { %p2666_p2 = pnand %p2664_p10, %p2945_p0  ;;  %p2673_p8 = por %p2672_p7, %p2671_p4 }
  0x61   : > { %p2667_p3 = pneg %p2666_p2 }
  0x63   : > { %p2674_p11 = pnand %p2673_p8, %p2667_p3 }
  0x65   : > { %2677 = shalt.err (!%p2674_p11)
}
  0x66   : > { %s2785_s13 = smov 128   ;;  %s2786_s28 = smov 8  }
  0x67   : > { %2450 = dma.hbm_to_vmem [thread:$0]  (!%p2929_p12), %s3273_s7, 512, %s2935_s16, [#allocation6], %s2785_s13, %s2785_s13, %s2786_s28  }
  0x68   : > { %s2787_s25 = smov [#allocation8]   ;;  %s2678_s14 = scalar_lea.hbm %s3274_s8, 16 }
  0x69   : > { %s398_s21 = sshll.u32 %s2787_s25, 4  ;;  %p2679_p13 = scmp.ne.s32.totalorder %s3274_s8, %s2678_s14  ;;  %s399_s21 = int_to_ptr.vmem [resolvable:$true] %s398_s21 }
  0x6a   : > { %p2685_p5 = scmp.lt.u32.totalorder %s2678_s14, %s3274_s8 }
  0x6b   : > { %p2681_p1 = pnand %p2679_p13, %p2945_p0 }
  0x6d   : > { %p2682_p6 = pneg %p2681_p1 }
  0x6f   : > { %p2687_p9 = pnand %p2685_p5, %p2682_p6 }
  0x71   : > { %2690 = shalt.err (!%p2687_p9)
}
  0x72   : > { %s2691_s16 = scalar_lea.vmem %s399_s21, 16  ;;  %s2698_s13 = scalar_lea.vmem %s399_s21, 32 }
  0x73   : > { %p2692_p10 = scmp.ne.s32.totalorder %s399_s21, %s2691_s16  ;;  %p2699_p4 = scmp.lt.s32.totalorder %s399_s21, %s399_s21 }
  0x74   : > { %p2700_p7 = scmp.lt.s32.totalorder %s2698_s13, %s2691_s16 }
  0x75   : > { %p2694_p2 = pnand %p2692_p10, %p2945_p0 }
  0x76   : > { %p2701_p8 = por %p2700_p7, %p2699_p4 }
  0x77   : > { %p2695_p3 = pneg %p2694_p2 }
  0x79   : > { %p2702_p11 = pnand %p2701_p8, %p2695_p3 }
  0x7b   : > { %2705 = shalt.err (!%p2702_p11)
}
  0x7c   : > { %2453 = dma.hbm_to_vmem [thread:$0]  (!%p2929_p12), %s3274_s8, 16, %s399_s21, [#allocation9]  }
  0x7d   : > { %p3306_p13 = scmp.ne.s32.totalorder %s3301_s20, 0 }
  0x7e   : > { %p3307_p1 = scmp.eq.s32.totalorder (!%p3306_p13), %s2893_s29, 0 }
  0x7f   : > { %431 = sbr.rel (%p3306_p13) target bundleno = 2240 (0x8c0), region = 72 }
  0x86   : > { %2751 = dma.done.wait (%p3307_p1), [#allocation3], 16   ;;  %p3308_p0 = pmov %p3307_p1 }
  0x88   : > { %2753 = vsyncadd (%p3308_p0), [#allocation3], 4294967280  ;;  %p3309_p6 = pmov %p3308_p0 }
  0x89   : > { %p3310_p5 = pmov %p3308_p0 }
  0x8a   : > { %2755 = dma.done.wait (%p3309_p6), [#allocation6], 528  }
  0x8b   : > { %2757 = vsyncadd (%p3310_p5), [#allocation6], 4294966768  ;;  %p3311_p9 = pmov %p3308_p0 }
  0x8c   : > { %p3312_p12 = pmov %p3308_p0 }
  0x8d   : > { %2759 = dma.done.wait (%p3311_p9), [#allocation9], 16  }
  0x8e   : > { %2761 = vsyncadd (%p3312_p12), [#allocation9], 4294967280  ;;  %p487_p10 = scmp.lt.s32.totalorder %s2893_s29, 1  ;;  %vm505_vm0 = vcmask 261120   ;;  %v494_v0 = vld [vmem:[%s3267_s1] sm:$0xff]  ;;  %v495_v1 = vld [vmem:[%s3267_s1 + $0x8] sm:$0xff] }
  0x8f   : > { %v496_v2 = vld [vmem:[%s3267_s1 + $0x10] sm:$0xff]  ;;  %v2345_v3 = vpack.c.bf16 %v495_v1, %v494_v0  ;;  %v497_v4 = vld [vmem:[%s3267_s1 + $0x18] sm:$0xff]  ;;  %v2109_v8 = vld [vmem:[%s3268_s2] ss:$0 sm:$0xff]  ;;  %vm593_vm1 = vcmask 64512   ;;  %s2788_s28 = smov 120  }
  0x90   : > { %s488_s5 = scalar_select %p487_p10, %s2893_s29, 1  ;;  %v2349_v6 = vpack.c.bf16 %v497_v4, %v496_v2  ;;  %vm3087_vm2 = vmpackc.low %vm593_vm1, %vm593_vm1  ;;  %vm677_vm3 = vcmask 130048   ;;  %v787_v17 = vld [vmem:[%s3269_s3] sm:$0xff]  ;;  %vm1873_vm4 = vcmask 523264  }
  0x91   : > { %2346 = vmatprep.subr.bf16.mxu1 %v2345_v3  ;;  %s2789_s17 = smov 96   ;;  %s2792_s20 = smov 80  }
  0x92   : > { %s2160_s6 = sshll.u32 %s488_s5, 4  ;;  %2348 = vmatpush3.bf16.msra.mxu1 %v2345_v3  ;;  %s2790_s5 = smov 88  }
  0x93   : > { %s491_s23 = scalar_lea.vmem %s3266_s0, %s2160_s6  ;;  %2350 = vmatprep.subr.bf16.mxu1 %v2349_v6  ;;  %s2791_s6 = smov 112  }
  0x94   : > { %v3057_v5 = vld [vmem:[%s491_s23] sm:$0xff]  ;;  %v3061_v7 = vld [vmem:[%s491_s23 + $0x8] sm:$0xff]  ;;  %s2793_s30 = smov 56   ;;  %s2794_s23 = smov 72  }
  0x95   : > { %2236 = vmatprep.mubr.msk.f32.mxu1 %vm505_vm0, %v3057_v5  ;;  %s2795_s19 = smov 64   ;;  %s2796_s25 = smov 104  }
  0x96   : > { %2352 = vmatpush3.bf16.msra.mxu1 %v2349_v6  ;;  %s2797_s21 = smov 48   ;;  %s2798_s15 = smov 40  }
  0x97   : > { %s2161_s27 = sshll.u32 %s2893_s29, 8  ;;  %s3315_s13 = sld [smem:[#allocation23_spill]] }
  0x98   : > { %p3316_p3 = scmp.ne.s32.totalorder %s3298_s18, 0 }
  0x99   : > { %2237 = vmatmul.mubr.msk.f32.vlgmr.msra.gmra.mrb[0].mxu1 %vm505_vm0, %v3061_v7 }
 0x16c   : > { %v2238_v9 = vpop.f32.mrb[0].mxu1 }
 0x16d   : > { %v3068_v10 = vadd.f32 %v2238_v9, %v2109_v8  ;;  %v578_v11 = vpop.f32.mrb[1].mxu1 }
 0x16e   : > { %v3070_v12 = vadd.f32 %v2109_v8, %v578_v11 }
 0x170   : > { %788 = vrot.lane.b32.xlu1 %v3070_v12, %s2788_s28  ;;  %2243 = vmatprep.mubr.msk.f32.mxu1 %vm593_vm1, %v3070_v12  ;;  %v3077_v13 = vpack.i.bf16 %v3068_v10, %v3070_v12 }
 0x172   : > { %2519 = vrot.lane.b32.xlu0 %v3077_v13, %s2789_s17 }
 0x174   : > { %790 = vrot.lane.b32.xlu1 %v3068_v10, %s2788_s28  ;;  %s3219_s28 = scalar_lea.hbm %s3315_s13, %s2161_s27 }
 0x176   : > { %2524 = vrot.lane.b32.xlu0 %v3077_v13, %s2790_s5  ;;  %s2799_s5 = smov [#allocation10]  }
 0x178   : > { %1151 = vrot.lane.b32.xlu1 %v3070_v12, %s2791_s6 }
 0x17a   : > { %2529 = vrot.lane.b32.xlu0 %v3077_v13, %s2792_s20 }
 0x17e   : > { %1153 = vrot.lane.b32.xlu0 %v3068_v10, %s2791_s6  ;;  %s484_s6 = sand.u32 1, %s2772_s26  }
 0x17f   : > { %s2106_s20 = sshll.u32 %s484_s6, 4  ;;  %s3225_s29 = scalar_lea.sflag [#allocation4], %s484_s6 }
 0x180   : > { %s486_s14 = scalar_lea.vmem [#allocation10], %s2106_s20  ;;  %s2710_s20 = sshll.u32 %s2799_s5, 4  ;;  %s2711_s20 = int_to_ptr.vmem [resolvable:$false] %s2710_s20 }
 0x181   : > { %s1991_s22 = sshll.u32 %s486_s14, 4  ;;  %s3221_s22 = int_to_ptr.vmem [resolvable:$true] %s1991_s22 }
 0x182   : > { %s2706_s17 = scalar_lea.vmem %s3221_s22, 256  ;;  %p2713_p8 = scmp.lt.s32.totalorder %s3221_s22, %s2711_s20 }
 0x183   : > { %p2707_p2 = scmp.ne.s32.totalorder %s3221_s22, %s2706_s17 }
 0x185   : > { %p2708_p4 = pnand %p2707_p2, %p3316_p3 }
 0x187   : > { %p2709_p7 = pneg %p2708_p4 }
 0x1e2   : > { %v789_v24 = vpop.permute.xlu1 %788 }
 0x1e4   : > { %v2520_v14 = vpop.permute.xlu0 %2519 }
 0x1e5   : > { %v2522_v15 = vunpack.i.h.bf16 %v2520_v14  ;;  %v2521_v16 = vunpack.i.l.bf16 %v2520_v14 }
 0x1e6   : > { %v791_v28 = vpop.permute.xlu1 %790 }
 0x1e7   : > { %v2353_v18 = vpack.c.bf16 %v2522_v15, %v2521_v16  ;;  %v988_v16 = vld [vmem:[%s3269_s3 + $0x8] sm:$0xff] }
 0x1e8   : > { %v2525_v19 = vpop.permute.xlu0 %2524 }
 0x1e9   : > { %v2527_v20 = vunpack.i.h.bf16 %v2525_v19  ;;  %v2526_v21 = vunpack.i.l.bf16 %v2525_v19  ;;  %2355 = vmatprep.subr.msk.bf16.mxu1 %vm3087_vm2, %v2353_v18 }
 0x1ea   : > { %2358 = vmatpush3.bf16.xpose.msk.msra.mxu1 %vm3087_vm2, %v2353_v18  ;;  %v1152_v29 = vpop.permute.xlu1 %1151 }
 0x1eb   : > { %v2363_v22 = vpack.c.bf16 %v2527_v20, %v2526_v21 }
 0x1ec   : > { %v2530_v23 = vpop.permute.xlu0 %2529 }
 0x1ed   : > { %v2532_v25 = vunpack.i.h.bf16 %v2530_v23  ;;  %v2531_v26 = vunpack.i.l.bf16 %v2530_v23  ;;  %2365 = vmatprep.subr.msk.bf16.mxu1 %vm3087_vm2, %v2363_v22 }
 0x1ef   : > { %v2373_v27 = vpack.c.bf16 %v2532_v25, %v2531_v26 }
 0x1f0   : > { %v1154_v30 = vpop.permute.xlu0 %1153 }
 0x1f1   : > { %2244 = vmatmul.mubr.msk.f32.vlgmr.msra.gmra.mrb[2].mxu1 %vm593_vm1, %v3068_v10 }
 0x1f2   : > { %2368 = vmatpush3.bf16.xpose.msk.msra.mxu1 %vm3087_vm2, %v2363_v22  ;;  %2257 = vmatprep.mubr.msk.f32.mxu1 %vm593_vm1, %v789_v24 }
 0x1f3   : > { %2375 = vmatprep.subr.msk.bf16.mxu1 %vm3087_vm2, %v2373_v27 }
 0x1f9   : > { %2258 = vmatmul.mubr.msk.f32.vlgmr.msra.gmra.mrb[4].mxu1 %vm593_vm1, %v791_v28 }
 0x1fa   : > { %2378 = vmatpush3.bf16.xpose.msk.msra.mxu1 %vm3087_vm2, %v2373_v27  ;;  %2281 = vmatprep.mubr.msk.f32.mxu1 %vm593_vm1, %v1152_v29 }
 0x201   : > { %2282 = vmatmul.mubr.msk.f32.vlgmr.msra.gmra.mrb[6].mxu1 %vm593_vm1, %v1154_v30 }
 0x2c4   : > { %v2245_v31 = vpop.f32.mrb[2].mxu1 }
 0x2c5   : > { %v668_v32 = vpop.f32.mrb[3].mxu1  ;;  %v681_v33 = vsel %vm677_vm3, %v2245_v31, -inf }
 0x2c6   : > { %682 = vmax.xlane.f32.xlu0 %v681_v33  ;;  %v678_v34 = vsel %vm677_vm3, %v668_v32, -inf }
 0x2c7   : > { %679 = vmax.xlane.f32.xlu1 %v678_v34 }
 0x2cc   : > { %v2259_v35 = vpop.f32.mrb[4].mxu1 }
 0x2cd   : > { %v870_v36 = vpop.f32.mrb[5].mxu1  ;;  %v882_v37 = vsel %vm677_vm3, %v2259_v35, -inf }
 0x2ce   : > { %883 = vmax.xlane.f32.xlu1 %v882_v37  ;;  %v879_v38 = vsel %vm677_vm3, %v870_v36, -inf }
 0x2cf   : > { %880 = vmax.xlane.f32.xlu0 %v879_v38 }
 0x2d4   : > { %v3113_v39 = vpop.f32.mrb[6].mxu1 }
 0x2d5   : > { %v3115_v40 = vpop.f32.mrb[7].mxu1  ;;  %v1245_v15 = vsel %vm677_vm3, %v3113_v39, -inf }
 0x2d6   : > { %v1242_v11 = vsel %vm677_vm3, %v3115_v40, -inf }
 0x2df   : > { %2539 = vrot.lane.b32.xlu1 %v3077_v13, %s2793_s30  ;;  %s2712_s30 = scalar_lea.vmem %s2711_s20, 512 }
 0x2e0   : > { %p2714_p11 = scmp.lt.s32.totalorder %s2712_s30, %s2706_s17 }
 0x2e2   : > { %p2715_p13 = por %p2714_p11, %p2713_p8 }
 0x2e3   : > { %2544 = vrot.lane.b32.xlu1 %v3077_v13, %s2794_s23 }
 0x2e4   : > { %p2716_p1 = pnand %p2715_p13, %p2709_p7 }
 0x2e5   : > { %2534 = vrot.lane.b32.xlu0 %v3077_v13, %s2795_s19 }
 0x2e7   : > { %1437 = vrot.lane.b32.xlu1 %v3068_v10, %s2796_s25 }
 0x2e9   : > { %1435 = vrot.lane.b32.xlu0 %v3070_v12, %s2796_s25 }
 0x353   : > { %v683_v41 = vpop.xlane.xlu0 %682 }
 0x354   : > { %v680_v42 = vpop.xlane.xlu1 %679  ;;  %v685_v44 = vsub.f32 %v2245_v31, %v683_v41 }
 0x355   : > { %v684_v43 = vsub.f32 %v668_v32, %v680_v42 }
 0x356   : > { %v688_v46 = vmul.f32 1.442695, %v685_v44 }
 0x357   : > { %v686_v45 = vmul.f32 1.442695, %v684_v43 }
 0x359   : > { %2558 = vpow2.f32 %v686_v45 }
 0x35a   : > { %2560 = vpow2.f32 %v688_v46 }
 0x35b   : > { %v884_v47 = vpop.xlane.xlu1 %883 }
 0x35c   : > { %v886_v48 = vsub.f32 %v2259_v35, %v884_v47  ;;  %v881_v49 = vpop.xlane.xlu0 %880 }
 0x35d   : > { %v885_v50 = vsub.f32 %v870_v36, %v881_v49 }
 0x35e   : > { %v889_v51 = vmul.f32 1.442695, %v886_v48 }
 0x35f   : > { %v887_v52 = vmul.f32 1.442695, %v885_v50  ;;  %v2540_v53 = vpop.permute.xlu1 %2539  ;;  %v1351_v50 = vld [vmem:[%s3269_s3 + $0x10] sm:$0xff] }
 0x360   : > { %2562 = vpow2.f32 %v889_v51  ;;  %v2542_v54 = vunpack.i.h.bf16 %v2540_v53  ;;  %v2535_v55 = vpop.permute.xlu0 %2534  ;;  %v2541_v56 = vunpack.i.l.bf16 %v2540_v53 }
 0x361   : > { %2564 = vpow2.f32 %v887_v52  ;;  %v2537_v57 = vunpack.i.h.bf16 %v2535_v55  ;;  %v2536_v58 = vunpack.i.l.bf16 %v2535_v55 }
 0x362   : > { %v2369_v1 = vpack.c.bf16 %v2542_v54, %v2541_v56 }
 0x363   : > { %v2559_v59 = vpop.eup %2558  ;;  %v2545_v60 = vpop.permute.xlu1 %2544  ;;  %v2359_v61 = vpack.c.bf16 %v2537_v57, %v2536_v58 }
 0x364   : > { %v2547_v62 = vunpack.i.h.bf16 %v2545_v60  ;;  %v2546_v63 = vunpack.i.l.bf16 %v2545_v60  ;;  %v1436_v0 = vpop.permute.xlu0 %1435  ;;  %2250 = vmatprep.mubr.msk.f32.mxu0 %vm677_vm3, %v2559_v59  ;;  %v2561_v3 = vpop.eup %2560  ;;  %v690_v12 = vsel %vm677_vm3, %v2559_v59, 0.0 }
 0x365   : > { %2360 = vmatprep.subr.bf16.mxu0 %v2359_v61  ;;  %2300 = vmatprep.mubr.msk.f32.mxu1 %vm593_vm1, %v1436_v0  ;;  %v693_v14 = vsel %vm677_vm3, %v2561_v3, 0.0 }
 0x366   : > { %v2383_v2 = vpack.c.bf16 %v2547_v62, %v2546_v63  ;;  %2362 = vmatpush3.bf16.msra.mxu0 %v2359_v61 }
 0x367   : > { %2370 = vmatprep.subr.bf16.mxu0 %v2369_v1  ;;  %v1438_v10 = vpop.permute.xlu1 %1437 }
 0x368   : > { %2385 = vmatprep.subr.msk.bf16.mxu1 %vm3087_vm2, %v2383_v2 }
 0x369   : > { %2251 = vmatmul.mubr.msk.f32.vlgmr.msra.gmra.mrb[0].mxu0 %vm677_vm3, %v2561_v3  ;;  %2388 = vmatpush3.bf16.xpose.msk.msra.mxu1 %vm3087_vm2, %v2383_v2 }
 0x36a   : > { %v2563_v4 = vpop.eup %2562  ;;  %2372 = vmatpush3.bf16.msra.mxu0 %v2369_v1 }
 0x36b   : > { %v2565_v6 = vpop.eup %2564  ;;  %v894_v8 = vsel %vm677_vm3, %v2563_v4, 0.0  ;;  %2267 = vmatprep.subr.mxu0 %v988_v16 }
 0x36c   : > { %2264 = vmatprep.mubr.msk.f32.mxu0 %vm677_vm3, %v2565_v6  ;;  %895 = vadd.xlane.f32.xlu1 %v894_v8  ;;  %v891_v9 = vsel %vm677_vm3, %v2565_v6, 0.0 }
 0x36d   : > { %892 = vadd.xlane.f32.xlu0 %v891_v9  ;;  %2265 = vmatmul.mubr.msk.f32.vlgmr.msra.gmra.mrb[2].mxu0 %vm677_vm3, %v2563_v4 }
 0x36e   : > { %2268 = vmatpush3.msra.mxu0 %v988_v16 }
 0x36f   : > { %2272 = vmatprep.subr.mxu0 %v787_v17 }
 0x370   : > { %1243 = vmax.xlane.f32.xlu1 %v1242_v11  ;;  %2301 = vmatmul.mubr.msk.f32.vlgmr.msra.gmra.mrb[8].mxu1 %vm593_vm1, %v1438_v10 }
 0x371   : > { %691 = vadd.xlane.f32.xlu0 %v690_v12  ;;  %v1635_v12 = vld [vmem:[%s3269_s3 + $0x18] sm:$0xff] }
 0x375   : > { %694 = vadd.xlane.f32.xlu0 %v693_v14 }
 0x379   : > { %1246 = vmax.xlane.f32.xlu0 %v1245_v15 }
 0x381   : > { %2549 = vrot.lane.b32.xlu1 %v3077_v13, %s2797_s21 }
 0x385   : > { %2554 = vrot.lane.b32.xlu1 %v3077_v13, %s2798_s15 }
 0x3f9   : > { %v896_v21 = vpop.xlane.xlu1 %895 }
 0x3fa   : > { %v893_v18 = vpop.xlane.xlu0 %892 }
 0x3fb   : > { %2566 = vrcp.f32 %v893_v18 }
 0x3fc   : > { %2568 = vrcp.f32 %v896_v21 }
 0x3fd   : > { %v1244_v23 = vpop.xlane.xlu1 %1243 }
 0x3fe   : > { %v692_v19 = vpop.xlane.xlu0 %691  ;;  %v1248_v13 = vsub.f32 %v3115_v40, %v1244_v23  ;;  %v1749_v23 = vld [vmem:[#allocation7 + $0x8] sm:$0xff] }
 0x3ff   : > { %2570 = vrcp.f32 %v692_v19 }
 0x400   : > { %v1250_v26 = vmul.f32 1.442695, %v1248_v13  ;;  %v1750_v13 = vld [vmem:[#allocation7 + $0x10] sm:$0xff] }
 0x401   : > { %v2550_v29 = vpop.permute.xlu1 %2549 }
 0x402   : > { %v695_v20 = vpop.xlane.xlu0 %694  ;;  %v2552_v32 = vunpack.i.h.bf16 %v2550_v29  ;;  %v2551_v33 = vunpack.i.l.bf16 %v2550_v29 }
 0x404   : > { %v2379_v41 = vpack.c.bf16 %v2552_v32, %v2551_v33 }
 0x405   : > { %v2567_v31 = vpop.eup %2566  ;;  %v2555_v48 = vpop.permute.xlu1 %2554 }
 0x406   : > { %v1247_v22 = vpop.xlane.xlu0 %1246  ;;  %v2569_v35 = vpop.eup %2568  ;;  %v2557_v51 = vunpack.i.h.bf16 %v2555_v48  ;;  %v2556_v52 = vunpack.i.l.bf16 %v2555_v48  ;;  %v1865_v48 = vld [vmem:[%s3275_s9 + $0x38] sm:$0xff] }
 0x407   : > { %v1249_v24 = vsub.f32 %v3113_v39, %v1247_v22  ;;  %v1748_v22 = vld [vmem:[#allocation7] sm:$0xff] }
 0x408   : > { %v2389_v54 = vpack.c.bf16 %v2557_v51, %v2556_v52 }
 0x409   : > { %v1252_v25 = vmul.f32 1.442695, %v1249_v24  ;;  %v2571_v39 = vpop.eup %2570  ;;  %v2393_v24 = vpack.c.bf16 %v1749_v23, %v1748_v22 }
 0x40b   : > { %2572 = vpow2.f32 %v1252_v25  ;;  %2394 = vmatprep.subr.bf16.mxu1 %v2393_v24  ;;  %v1751_v25 = vld [vmem:[#allocation7 + $0x18] sm:$0xff] }
 0x40c   : > { %2574 = vpow2.f32 %v1250_v26  ;;  %2396 = vmatpush3.bf16.msra.mxu1 %v2393_v24  ;;  %v2397_v26 = vpack.c.bf16 %v1751_v25, %v1750_v13 }
 0x40d   : > { %2576 = vrcp.f32 %v695_v20 }
 0x40e   : > { %2398 = vmatprep.subr.bf16.mxu1 %v2397_v26 }
 0x410   : > { %2400 = vmatpush3.bf16.msra.mxu1 %v2397_v26 }
 0x415   : > { %v2573_v44 = vpop.eup %2572 }
 0x416   : > { %v2575_v45 = vpop.eup %2574  ;;  %v1257_v46 = vsel %vm677_vm3, %v2573_v44, 0.0 }
 0x417   : > { %v2577_v47 = vpop.eup %2576  ;;  %v1254_v53 = vsel %vm677_vm3, %v2575_v45, 0.0 }
 0x43c   : > { %v2252_v27 = vpop.f32.mrb[0].mxu0 }
 0x43d   : > { %v774_v28 = vpop.f32.mrb[1].mxu0  ;;  %v786_v49 = vmul.f32 %v2577_v47, %v2252_v27  ;;  %v2144_v27 = vld [vmem:[%s3270_s4] ss:$0 sm:$0xff]  ;;  %v1864_v47 = vld [vmem:[%s3275_s9 + $0x30] sm:$0xff] }
 0x43e   : > { %v785_v42 = vmul.f32 %v2571_v39, %v774_v28 }
 0x440   : > { %v2266_v30 = vpop.f32.mrb[2].mxu0 }
 0x441   : > { %v975_v34 = vpop.f32.mrb[3].mxu0  ;;  %v987_v37 = vmul.f32 %v2569_v35, %v2266_v30 }
 0x442   : > { %v986_v36 = vmul.f32 %v2567_v31, %v975_v34  ;;  %v2145_v31 = vld [vmem:[#allocation2] ss:$0 sm:$0xff] }
 0x443   : > { %v2302_v38 = vpop.f32.mrb[8].mxu1 }
 0x444   : > { %2269 = vmatprep.mubr.msk.f32.mxu0 %vm593_vm1, %v986_v36  ;;  %v1517_v40 = vpop.f32.mrb[9].mxu1  ;;  %v1529_v55 = vsel %vm677_vm3, %v2302_v38, -inf  ;;  %v2146_v36 = vld [vmem:[#allocation5] ss:$0 sm:$0xff] }
 0x445   : > { %2270 = vmatmul.mubr.msk.f32.vlgmr.msra.gmra.mrb[4].mxu0 %vm593_vm1, %v987_v37  ;;  %v1526_v43 = vsel %vm677_vm3, %v1517_v40, -inf }
 0x446   : > { %2273 = vmatpush3.msra.mxu0 %v787_v17  ;;  %1527 = vmax.xlane.f32.xlu0 %v1526_v43 }
 0x447   : > { %2274 = vmatprep.mubr.msk.f32.mxu0 %vm593_vm1, %v785_v42  ;;  %2380 = vmatprep.subr.bf16.mxu0 %v2379_v41  ;;  %v1861_v42 = vld [vmem:[%s3275_s9 + $0x18] sm:$0xff] }
 0x44a   : > { %1258 = vadd.xlane.f32.xlu0 %v1257_v46 }
 0x44d   : > { %2275 = vmatmul.mubr.msk.f32.vlgmr.msra.gmra.mrb[4].mxu0 %vm593_vm1, %v786_v49  ;;  %v2413_v49 = vpack.c.bf16 %v1865_v48, %v1864_v47 }
 0x44e   : > { %2382 = vmatpush3.bf16.msra.mxu0 %v2379_v41  ;;  %1255 = vadd.xlane.f32.xlu0 %v1254_v53  ;;  %v1859_v41 = vld [vmem:[%s3275_s9 + $0x8] sm:$0xff] }
 0x44f   : > { %2288 = vmatprep.mubr.msk.f32.mxu0 %vm677_vm3, %v2575_v45  ;;  %2291 = vmatprep.subr.mxu0 %v1351_v50  ;;  %v1863_v45 = vld [vmem:[%s3275_s9 + $0x28] sm:$0xff] }
 0x451   : > { %2289 = vmatmul.mubr.msk.f32.vlgmr.msra.gmra.mrb[6].mxu0 %vm677_vm3, %v2573_v44  ;;  %v1862_v44 = vld [vmem:[%s3275_s9 + $0x20] sm:$0xff] }
 0x452   : > { %2292 = vmatpush3.msra.mxu0 %v1351_v50  ;;  %1530 = vmax.xlane.f32.xlu0 %v1529_v55  ;;  %v2409_v46 = vpack.c.bf16 %v1863_v45, %v1862_v44  ;;  %v2147_v50 = vld [vmem:[#allocation8] ss:$0 sm:$0xff] }
 0x453   : > { %2390 = vmatprep.subr.bf16.mxu0 %v2389_v54 }
 0x4d3   : > { %v1528_v56 = vpop.xlane.xlu0 %1527 }
 0x4d4   : > { %v1532_v57 = vsub.f32 %v1517_v40, %v1528_v56  ;;  %v1858_v40 = vld [vmem:[%s3275_s9] sm:$0xff] }
 0x4d6   : > { %v1534_v58 = vmul.f32 1.442695, %v1532_v57 }
 0x4d7   : > { %v1259_v59 = vpop.xlane.xlu0 %1258 }
 0x4d8   : > { %2578 = vpow2.f32 %v1534_v58 }
 0x4db   : > { %v1256_v60 = vpop.xlane.xlu0 %1255 }
 0x4df   : > { %v1531_v61 = vpop.xlane.xlu0 %1530 }
 0x4e0   : > { %v1533_v62 = vsub.f32 %v2302_v38, %v1531_v61 }
 0x4e2   : > { %v2579_v63 = vpop.eup %2578  ;;  %v1536_v0 = vmul.f32 1.442695, %v1533_v62 }
 0x4e3   : > { %v1538_v1 = vsel %vm677_vm3, %v2579_v63, 0.0 }
 0x4e4   : > { %2580 = vpow2.f32 %v1536_v0  ;;  %1539 = vadd.xlane.f32.xlu0 %v1538_v1 }
 0x4e5   : > { %2582 = vrcp.f32 %v1259_v59 }
 0x4e6   : > { %2584 = vrcp.f32 %v1256_v60 }
 0x4ee   : > { %v2581_v2 = vpop.eup %2580 }
 0x4ef   : > { %v1541_v3 = vsel %vm677_vm3, %v2581_v2, 0.0  ;;  %v2583_v4 = vpop.eup %2582 }
 0x4f0   : > { %1542 = vadd.xlane.f32.xlu1 %v1541_v3  ;;  %v2585_v8 = vpop.eup %2584 }
 0x524   : > { %v2290_v6 = vpop.f32.mrb[6].mxu0 }
 0x525   : > { %v1350_v9 = vmul.f32 %v2583_v4, %v2290_v6  ;;  %v1338_v10 = vpop.f32.mrb[7].mxu0 }
 0x526   : > { %v1349_v11 = vmul.f32 %v2585_v8, %v1338_v10 }
 0x528   : > { %2293 = vmatprep.mubr.msk.f32.mxu0 %vm593_vm1, %v1349_v11  ;;  %v2150_v11 = vld [vmem:[%s3276_s10] ss:$0 sm:$0xff] }
 0x529   : > { %2294 = vmatmul.mubr.msk.f32.vlgmr.msra.gmra.mrb[4].mxu0 %vm593_vm1, %v1350_v9 }
 0x52a   : > { %2392 = vmatpush3.bf16.msra.mxu0 %v2389_v54  ;;  %2307 = vmatprep.mubr.msk.f32.mxu0 %vm677_vm3, %v2579_v63 }
 0x52b   : > { %2310 = vmatprep.subr.mxu0 %v1635_v12 }
 0x52d   : > { %2308 = vmatmul.mubr.msk.f32.vlgmr.msra.gmra.mrb[8].mxu0 %vm677_vm3, %v2581_v2 }
 0x52e   : > { %2311 = vmatpush3.msra.mxu0 %v1635_v12 }
 0x571   : > { %v1540_v14 = vpop.xlane.xlu0 %1539 }
 0x572   : > { %2586 = vrcp.f32 %v1540_v14 }
 0x57c   : > { %v2587_v17 = vpop.eup %2586 }
 0x57d   : > { %v1543_v15 = vpop.xlane.xlu1 %1542 }
 0x57e   : > { %2588 = vrcp.f32 %v1543_v15 }
 0x588   : > { %v2589_v19 = vpop.eup %2588 }
 0x600   : > { %v2309_v16 = vpop.f32.mrb[8].mxu0 }
 0x601   : > { %v1622_v18 = vpop.f32.mrb[9].mxu0  ;;  %v1634_v21 = vmul.f32 %v2589_v19, %v2309_v16  ;;  %v2153_v16 = vld [vmem:[%s3277_s11] ss:$0 sm:$0xff] }
 0x602   : > { %v1633_v20 = vmul.f32 %v2587_v17, %v1622_v18  ;;  %v2154_v19 = vld [vmem:[%s3278_s12] ss:$0 sm:$0xff] }
 0x604   : > { %2312 = vmatprep.mubr.msk.f32.mxu0 %vm593_vm1, %v1633_v20 }
 0x605   : > { %2313 = vmatmul.mubr.msk.f32.vlgmr.msra.gmra.mrb[4].mxu0 %vm593_vm1, %v1634_v21 }
 0x6d8   : > { %v2314_v28 = vpop.f32.mrb[4].mxu0 }
 0x6d9   : > { %v1727_v29 = vadd.f32 %v2314_v28, %v2144_v27  ;;  %v1708_v30 = vpop.f32.mrb[5].mxu0 }
 0x6da   : > { %v1726_v32 = vadd.f32 %v2144_v27, %v1708_v30 }
 0x6db   : > { %v1729_v33 = vadd.f32 %v1727_v29, %v3061_v7  ;;  %v2401_v7 = vpack.c.bf16 %v1859_v41, %v1858_v40 }
 0x6dc   : > { %v1728_v34 = vadd.f32 %v1726_v32, %v3057_v5  ;;  %v1860_v5 = vld [vmem:[%s3275_s9 + $0x10] sm:$0xff] }
 0x6dd   : > { %v1738_v35 = vmul.f32 %v2145_v31, %v1729_v33  ;;  %v2405_v43 = vpack.c.bf16 %v1861_v42, %v1860_v5  ;;  %2402 = vmatprep.subr.bf16.mxu0 %v2401_v7 }
 0x6de   : > { %v1737_v37 = vmul.f32 %v2145_v31, %v1728_v34  ;;  %2404 = vmatpush3.bf16.msra.mxu0 %v2401_v7 }
 0x6df   : > { %v1747_v39 = vadd.f32 %v2146_v36, %v1738_v35  ;;  %2406 = vmatprep.subr.bf16.mxu0 %v2405_v43 }
 0x6e0   : > { %v1746_v38 = vadd.f32 %v2146_v36, %v1737_v37 }
 0x6e2   : > { %2323 = vmatprep.mubr.msk.f32.mxu1 %vm505_vm0, %v1746_v38  ;;  %2408 = vmatpush3.bf16.msra.mxu0 %v2405_v43 }
 0x6e3   : > { %2324 = vmatmul.mubr.msk.f32.vlgmr.msra.gmra.mrb[10].mxu1 %vm505_vm0, %v1747_v39  ;;  %2410 = vmatprep.subr.bf16.mxu0 %v2409_v46 }
 0x6e6   : > { %2412 = vmatpush3.bf16.msra.mxu0 %v2409_v46 }
 0x6e7   : > { %2414 = vmatprep.subr.bf16.mxu0 %v2413_v49 }
 0x6ea   : > { %2416 = vmatpush3.bf16.msra.mxu0 %v2413_v49 }
 0x7b6   : > { %v2325_v51 = vpop.f32.mrb[10].mxu1 }
 0x7b7   : > { %v1837_v52 = vadd.f32 %v2325_v51, %v2147_v50  ;;  %v1831_v53 = vpop.f32.mrb[11].mxu1 }
 0x7b8   : > { %v1832_v54 = vadd.f32 %v2147_v50, %v1831_v53 }
 0x7b9   : > { %v1843_v55 = vmul.f32 0.044715, %v1837_v52  ;;  %v1841_v8 = vmul.f32 0.5, %v1837_v52 }
 0x7ba   : > { %v1842_v56 = vmul.f32 0.044715, %v1832_v54  ;;  %v1840_v4 = vmul.f32 0.5, %v1832_v54 }
 0x7bb   : > { %v1845_v57 = vmul.f32 %v1843_v55, %v1837_v52 }
 0x7bc   : > { %v1844_v58 = vmul.f32 %v1842_v56, %v1832_v54 }
 0x7bd   : > { %v1847_v59 = vmul.f32 %v1845_v57, %v1837_v52 }
 0x7be   : > { %v1846_v60 = vmul.f32 %v1844_v58, %v1832_v54 }
 0x7bf   : > { %v1849_v61 = vadd.f32 %v1847_v59, %v1837_v52 }
 0x7c0   : > { %v1848_v62 = vadd.f32 %v1846_v60, %v1832_v54 }
 0x7c1   : > { %v1851_v63 = vmul.f32 0.7978846, %v1849_v61 }
 0x7c2   : > { %v1850_v0 = vmul.f32 0.7978846, %v1848_v62 }
 0x7c3   : > { %2590 = vtanh.f32 %v1851_v63 }
 0x7c4   : > { %2592 = vtanh.f32 %v1850_v0 }
 0x7cd   : > { %v2591_v1 = vpop.eup %2590 }
 0x7ce   : > { %v2593_v2 = vpop.eup %2592  ;;  %v1855_v3 = vadd.f32 1.0, %v2591_v1 }
 0x7cf   : > { %v1854_v6 = vadd.f32 1.0, %v2593_v2 }
 0x7d0   : > { %v1857_v10 = vmul.f32 %v1855_v3, %v1841_v8 }
 0x7d1   : > { %v1856_v9 = vmul.f32 %v1854_v6, %v1840_v4 }
 0x7d3   : > { %2342 = vmatprep.mubr.msk.f32.mxu0 %vm1873_vm4, %v1856_v9 }
 0x7d4   : > { %2343 = vmatmul.mubr.msk.f32.vlgmr.msra.gmra.mrb[10].mxu0 %vm1873_vm4, %v1857_v10 }
 0x8a7   : > { %v2344_v12 = vpop.f32.mrb[10].mxu0 }
 0x8a8   : > { %v1952_v14 = vadd.f32 %v2344_v12, %v2150_v11  ;;  %v1946_v15 = vpop.f32.mrb[11].mxu0 }
 0x8a9   : > { %v1947_v17 = vadd.f32 %v2150_v11, %v1946_v15 }
 0x8aa   : > { %v1956_v18 = vadd.f32 %v1952_v14, %v1747_v39 }
 0x8ab   : > { %v1955_v20 = vadd.f32 %v1947_v17, %v1746_v38 }
 0x8ac   : > { %v1965_v21 = vmul.f32 %v2153_v16, %v1956_v18 }
 0x8ad   : > { %v1964_v22 = vmul.f32 %v2153_v16, %v1955_v20 }
 0x8ae   : > { %v1974_v23 = vadd.f32 %v2154_v19, %v1965_v21 }
 0x8af   : > { %v1973_v24 = vadd.f32 %v2154_v19, %v1964_v22 }
 0x8b0   : > { %1976 = vst.msk [vmem:[%s486_s14 + $0x8] sm:$0xff] %vm505_vm0, %v1974_v23 }
 0x8b1   : > { %1975 = vst.msk [vmem:[%s486_s14] sm:$0xff] %vm505_vm0, %v1973_v24 }
 0x8b2   : > { %2719 = shalt.err (!%p2716_p1)
}
 0x8b3   : > { %s2720_s6 = scalar_lea.hbm %s3219_s28, 256  ;;  %s2724_s25 = scalar_lea.hbm %s3315_s13, 512 }
 0x8b4   : > { %p2721_p0 = scmp.ne.s32.totalorder %s3219_s28, %s2720_s6  ;;  %p2725_p9 = scmp.lt.u32.totalorder %s3219_s28, %s3315_s13 }
 0x8b5   : > { %p2726_p12 = scmp.lt.u32.totalorder %s2724_s25, %s2720_s6  ;;  %p2728_p2 = scmp.lt.u32.totalorder %s2720_s6, %s3219_s28 }
 0x8b6   : > { %p2722_p6 = pnand %p2721_p0, %p3316_p3 }
 0x8b7   : > { %p2727_p10 = por %p2726_p12, %p2725_p9 }
 0x8b8   : > { %p2723_p5 = pneg %p2722_p6 }
 0x8b9   : > { %p2729_p4 = por %p2728_p2, %p2727_p10 }
 0x8bb   : > { %p2730_p7 = pnand %p2729_p4, %p2723_p5 }
 0x8bd   : > { %2733 = shalt.err (!%p2730_p7)
}
 0x8be   : > { %s2800_s27 = smov 128   ;;  %s2801_s14 = smov 8  }
 0x8bf   : > { %2439 = dma.vmem_to_hbm [thread:$0]  (%p3316_p3), %s3221_s22, 256, %s3219_s28, %s3225_s29, %s2800_s27, %s2800_s27, %s2801_s14  }
 0x8c0 PF: > { %s3317_s24 = sld [smem:[#allocation17_spill]]  ;;  %s3318_s16 = sld [smem:[#allocation15_spill]] }
 0x8c1   : > { %s3319_s17 = sld [smem:[#allocation20_spill]] }
 0x8c6   : > { %p2466_p8 = scmp.ge.s32.totalorder %s3317_s24, 2  ;;  %s2006_s5 = sand.u32 1, %s3318_s16  }
 0x8c7   : > { %p3320_p11 = scmp.ne.s32.totalorder %s3319_s17, 0  ;;  %s2007_s20 = scalar_lea.sflag [#allocation4], %s2006_s5 }
 0x8c9   : > { %p2455_p13 = pnand %p2466_p8, %p3320_p11 }
 0x8cb   : > { %2763 = dma.done.wait (!%p2455_p13), %s2007_s20, 256  }
 0x8cc   : > { %2765 = vsyncadd (!%p2455_p13), %s2007_s20, 4294967040  ;;  %s3321_s28 = sld [smem:[#allocation18_spill]]  ;;  %s3322_s30 = sld [smem:[#allocation16_spill]] }
 0x8cd   : > { %s3323_s27 = sld [smem:[#allocation19_spill]]  ;;  %s3324_s25 = smov %s2772_s26 }
 0x8d2   : > { %p26_p1 = scmp.ge.s32.totalorder %s3321_s28, 4   ;;  %s3325_s26 = smov %s3322_s30 }
 0x8d4   :  { %28 = sbr.rel (!%p26_p1) target bundleno = 10 (0xa), region = 124 }
 0x8db   :  { %2012 = vsyncpa [#allocation3], 1 }
 0x8dc   :  { %2014 = vsyncpa [#allocation3 + $0x1], 1 }
 0x8dd   :  { %2015 = vsyncpa [#allocation6], 1 }
 0x8de   :  { %2016 = vsyncpa [#allocation9], 1 }
 0x8df   :  { %2017 = vsyncpa [#allocation4], 1 }
 0x8e0   :  { %2019 = vsyncpa [#allocation4 + $0x1], 1 }

// kernel: tpu_custom_call.1
= control target key start
LH: loop header
LB: loop body
LE: loop exit
PB: predicated region body
PF: predicated region fallthrough
CT: control target
= control target key end

     0   :  { %s3266_s0 = inlined_call_operand.vmem [shape: f32[2,16,32], index: 0, kind: input, shape index: {}]   ;;  %s3267_s1 = inlined_call_operand.vmem [shape: f32[32,96], index: 1, kind: input, shape index: {}]   ;;  %s3268_s2 = inlined_call_operand.vmem [shape: f32[1,96], index: 2, kind: input, shape index: {}]   ;;  %s3269_s3 = inlined_call_operand.vmem [shape: f32[32,32], index: 3, kind: input, shape index: {}]   ;;  %s3270_s4 = inlined_call_operand.vmem [shape: f32[1,32], index: 4, kind: input, shape index: {}]   ;;  %s3271_s5 = inlined_call_operand.hbm [shape: f32[1,32], index: 5, kind: input, shape index: {}]   ;;  %s3272_s6 = inlined_call_operand.hbm [shape: f32[1,32], index: 6, kind: input, shape index: {}]   ;;  %s3273_s7 = inlined_call_operand.hbm [shape: f32[32,64], index: 7, kind: input, shape index: {}]   ;;  %s3274_s8 = inlined_call_operand.hbm [shape: f32[1,64], index: 8, kind: input, shape index: {}]   ;;  %s3275_s9 = inlined_call_operand.vmem [shape: f32[64,32], index: 9, kind: input, shape index: {}]   ;;  %s3276_s10 = inlined_call_operand.vmem [shape: f32[1,32], index: 10, kind: input, shape index: {}]   ;;  %s3277_s11 = inlined_call_operand.vmem [shape: f32[1,32], index: 11, kind: input, shape index: {}]   ;;  %s3278_s12 = inlined_call_operand.vmem [shape: f32[1,32], index: 12, kind: input, shape index: {}]   ;;  %s3279_s13 = inlined_call_operand.hbm [shape: f32[2,16,32], index: 13, kind: output, shape index: {}]  }
   0x1   :  { %3290 = sst [smem:[#allocation21_spill]] %s3271_s5 }
   0x2   :  { %3291 = sst [smem:[#allocation22_spill]] %s3272_s6 }
   0x3   :  { %3292 = sst [smem:[#allocation23_spill]] %s3279_s13 }
   0x4   :  { %18 = vsyncpa [#allocation3], 0 }
   0x5   :  { %19 = vsyncpa [#allocation6], 0 }
   0x6   :  { %20 = vsyncpa [#allocation9], 0 }
   0x7   :  { %21 = vsyncpa [#allocation4], 0 }
   0x8   :  { %23 = vsyncpa [#allocation4 + $0x1], 0  ;;  %s2872_s25 = smov 0   ;;  %s2874_s26 = smov 0  }
   0x9   :  { %s2876_s27 = smov 0   ;;  %s2878_s28 = smov 0  }
   0xa LB: > { %3293 = sst [smem:[#allocation15_spill]] %s2768_s25  ;;  %s2893_s29 = sadd.s32 4294967295, %s2780_s28   ;;  %s2780_s28 = sphi %s2878_s28, %s3321_s28   ;;  %s2776_s27 = sphi %s2876_s27, %s3323_s27   ;;  %s2772_s26 = sphi %s2874_s26, %s3325_s26   ;;  %s2768_s25 = sphi %s2872_s25, %s3324_s25  }
   0xb   : > { %3294 = sst [smem:[#allocation16_spill]] %s2776_s27  ;;  %s2094_s30 = sadd.s32 4294967294, %s2780_s28  }
   0xc   : > { %3295 = sst [smem:[#allocation17_spill]] %s2780_s28  ;;  %s2897_s14 = sadd.s32 1, %s2780_s28  }
   0xd   : > { %3296 = sst [smem:[#allocation18_spill]] %s2897_s14  ;;  %s314_s15 = sadd.s32 1, %s2776_s27 }
   0xe   : > { %s311_s16 = ssub.s32 %s2780_s28, %s2897_s14  ;;  %p324_p0 = scmp.ne.s32.totalorder %s2776_s27, %s2772_s26 }
   0xf   : > { %p312_p1 = scmp.eq.s32.totalorder %s311_s16, 0  ;;  %p325_p2 = scmp.eq.s32.totalorder %s2893_s29, 1 }
  0x10   : > { %p330_p3 = scmp.ne.s32.totalorder %s2772_s26, %s2768_s25  ;;  %p331_p4 = scmp.eq.s32.totalorder %s2094_s30, 1 }
  0x11   : > { %s2908_s17 = scalar_select %p312_p1, %s2776_s27, %s314_s15  }
  0x12   : > { %p2910_p5 = por %p325_p2, %p324_p0  ;;  %p2914_p6 = por %p331_p4, %p330_p3 }
  0x13   : > { %3297 = sst [smem:[#allocation19_spill]] %s2908_s17  ;;  %p2095_p7 = scmp.ge.s32.totalorder %s2780_s28, 1 }
  0x14   : > { %s3298_s18 = scalar_select %p2910_p5, 1, 0 }
  0x15   : > { %s3299_s19 = scalar_select %p2914_p6, 1, 0 }
  0x16   : > { %p338_p8 = scmp.lt.s32.totalorder %s2780_s28, 3  ;;  %p3285_p9 = scmp.eq.s32.totalorder %s2893_s29, 0 }
  0x17   : > { %3300 = sst [smem:[#allocation20_spill]] %s3299_s19  ;;  %s2782_s21 = smov [#allocation5]  }
  0x18   : > { %p2921_p10 = pnand %p2095_p7, %p338_p8  ;;  %s374_s22 = sshll.u32 %s2782_s21, 4  ;;  %s375_s22 = int_to_ptr.vmem [resolvable:$true] %s374_s22 }
  0x19   : > { %s2783_s23 = smov [#allocation2]   ;;  %s2784_s15 = smov [#allocation7]  }
  0x1a   : > { %s3301_s20 = scalar_select %p2921_p10, 1, 0 }
  0x1b   : > { %p2441_p11 = pneg %p2921_p10  ;;  %s363_s24 = sshll.u32 %s2783_s23, 4  ;;  %s2933_s24 = int_to_ptr.vmem [resolvable:$true] %s363_s24 }
  0x1c   : > { %s384_s16 = sshll.u32 %s2784_s15, 4  ;;  %s3303_s6 = sld [smem:[#allocation22_spill]]  ;;  %s2935_s16 = int_to_ptr.vmem [resolvable:$true] %s384_s16 }
  0x1d   : > { %p2929_p12 = pnand %p3285_p9, %p2441_p11 }
  0x1f   : > { %p2945_p0 = pneg %p2929_p12 }
  0x22   : > { %s2594_s21 = scalar_lea.hbm %s3303_s6, 16 }
  0x23   : > { %p2595_p13 = scmp.ne.s32.totalorder %s3303_s6, %s2594_s21  ;;  %p2601_p3 = scmp.lt.u32.totalorder %s2594_s21, %s3303_s6 }
  0x25   : > { %p2597_p1 = pnand %p2945_p0, %p2595_p13 }
  0x27   : > { %p2598_p2 = pneg %p2597_p1 }
  0x29   : > { %p2603_p4 = pnand %p2601_p3, %p2598_p2 }
  0x2b   : > { %2606 = shalt.err (!%p2603_p4)
}
  0x2c   : > { %s2607_s27 = scalar_lea.vmem %s375_s22, 16  ;;  %s2614_s14 = scalar_lea.vmem %s375_s22, 32 }
  0x2d   : > { %p2608_p7 = scmp.ne.s32.totalorder %s375_s22, %s2607_s27  ;;  %p2615_p9 = scmp.lt.s32.totalorder %s375_s22, %s375_s22 }
  0x2e   : > { %p2616_p6 = scmp.lt.s32.totalorder %s2614_s14, %s2607_s27 }
  0x2f   : > { %p2610_p8 = pnand %p2608_p7, %p2945_p0 }
  0x30   : > { %p2617_p5 = por %p2616_p6, %p2615_p9 }
  0x31   : > { %p2611_p11 = pneg %p2610_p8 }
  0x33   : > { %p2618_p10 = pnand %p2617_p5, %p2611_p11 }
  0x35   : > { %2621 = shalt.err (!%p2618_p10)
}
  0x36   : > { %2447 = dma.hbm_to_vmem [thread:$0]  (!%p2929_p12), %s3303_s6, 16, %s375_s22, [#allocation6]  }
  0x37   : > { %s3305_s5 = sld [smem:[#allocation21_spill]] }
  0x3d   : > { %s2622_s15 = scalar_lea.hbm %s3305_s5, 16 }
  0x3e   : > { %p2623_p13 = scmp.ne.s32.totalorder %s3305_s5, %s2622_s15  ;;  %p2629_p5 = scmp.lt.u32.totalorder %s2622_s15, %s3305_s5 }
  0x40   : > { %p2625_p1 = pnand %p2623_p13, %p2945_p0 }
  0x42   : > { %p2626_p6 = pneg %p2625_p1 }
  0x44   : > { %p2631_p9 = pnand %p2629_p5, %p2626_p6 }
  0x46   : > { %2634 = shalt.err (!%p2631_p9)
}
  0x47   : > { %s2635_s22 = scalar_lea.vmem %s2933_s24, 16  ;;  %s2642_s13 = scalar_lea.vmem %s2933_s24, 32 }
  0x48   : > { %p2636_p10 = scmp.ne.s32.totalorder %s2933_s24, %s2635_s22  ;;  %p2643_p4 = scmp.lt.s32.totalorder %s2933_s24, %s2933_s24 }
  0x49   : > { %p2644_p7 = scmp.lt.s32.totalorder %s2642_s13, %s2635_s22 }
  0x4a   : > { %p2638_p2 = pnand %p2636_p10, %p2945_p0 }
  0x4b   : > { %p2645_p8 = por %p2644_p7, %p2643_p4 }
  0x4c   : > { %p2639_p3 = pneg %p2638_p2 }
  0x4e   : > { %p2646_p11 = pnand %p2645_p8, %p2639_p3 }
  0x50   : > { %2649 = shalt.err (!%p2646_p11)
}
  0x51   : > { %2444 = dma.hbm_to_vmem [thread:$0]  (!%p2929_p12), %s3305_s5, 16, %s2933_s24, [#allocation3]  }
  0x52   : > { %s2650_s21 = scalar_lea.hbm %s3273_s7, 512 }
  0x53   : > { %p2651_p13 = scmp.ne.s32.totalorder %s3273_s7, %s2650_s21  ;;  %p2657_p5 = scmp.lt.u32.totalorder %s2650_s21, %s3273_s7 }
  0x55   : > { %p2653_p1 = pnand %p2651_p13, %p2945_p0 }
  0x57   : > { %p2654_p6 = pneg %p2653_p1 }
  0x59   : > { %p2659_p9 = pnand %p2657_p5, %p2654_p6 }
  0x5b   : > { %2662 = shalt.err (!%p2659_p9)
}
  0x5c   : > { %s2663_s24 = scalar_lea.vmem %s2935_s16, 512  ;;  %p2671_p4 = scmp.lt.s32.totalorder %s2935_s16, %s2935_s16 }
  0x5d   : > { %p2664_p10 = scmp.ne.s32.totalorder %s2935_s16, %s2663_s24  ;;  %p2672_p7 = scmp.lt.s32.totalorder %s2663_s24, %s2663_s24 }
  0x5f   : > { %p2666_p2 = pnand %p2664_p10, %p2945_p0  ;;  %p2673_p8 = por %p2672_p7, %p2671_p4 }
  0x61   : > { %p2667_p3 = pneg %p2666_p2 }
  0x63   : > { %p2674_p11 = pnand %p2673_p8, %p2667_p3 }
  0x65   : > { %2677 = shalt.err (!%p2674_p11)
}
  0x66   : > { %s2785_s13 = smov 128   ;;  %s2786_s28 = smov 8  }
  0x67   : > { %2450 = dma.hbm_to_vmem [thread:$0]  (!%p2929_p12), %s3273_s7, 512, %s2935_s16, [#allocation6], %s2785_s13, %s2785_s13, %s2786_s28  }
  0x68   : > { %s2787_s25 = smov [#allocation8]   ;;  %s2678_s14 = scalar_lea.hbm %s3274_s8, 16 }
  0x69   : > { %s398_s21 = sshll.u32 %s2787_s25, 4  ;;  %p2679_p13 = scmp.ne.s32.totalorder %s3274_s8, %s2678_s14  ;;  %s399_s21 = int_to_ptr.vmem [resolvable:$true] %s398_s21 }
  0x6a   : > { %p2685_p5 = scmp.lt.u32.totalorder %s2678_s14, %s3274_s8 }
  0x6b   : > { %p2681_p1 = pnand %p2679_p13, %p2945_p0 }
  0x6d   : > { %p2682_p6 = pneg %p2681_p1 }
  0x6f   : > { %p2687_p9 = pnand %p2685_p5, %p2682_p6 }
  0x71   : > { %2690 = shalt.err (!%p2687_p9)
}
  0x72   : > { %s2691_s16 = scalar_lea.vmem %s399_s21, 16  ;;  %s2698_s13 = scalar_lea.vmem %s399_s21, 32 }
  0x73   : > { %p2692_p10 = scmp.ne.s32.totalorder %s399_s21, %s2691_s16  ;;  %p2699_p4 = scmp.lt.s32.totalorder %s399_s21, %s399_s21 }
  0x74   : > { %p2700_p7 = scmp.lt.s32.totalorder %s2698_s13, %s2691_s16 }
  0x75   : > { %p2694_p2 = pnand %p2692_p10, %p2945_p0 }
  0x76   : > { %p2701_p8 = por %p2700_p7, %p2699_p4 }
  0x77   : > { %p2695_p3 = pneg %p2694_p2 }
  0x79   : > { %p2702_p11 = pnand %p2701_p8, %p2695_p3 }
  0x7b   : > { %2705 = shalt.err (!%p2702_p11)
}
  0x7c   : > { %2453 = dma.hbm_to_vmem [thread:$0]  (!%p2929_p12), %s3274_s8, 16, %s399_s21, [#allocation9]  }
  0x7d   : > { %p3306_p13 = scmp.ne.s32.totalorder %s3301_s20, 0 }
  0x7e   : > { %p3307_p1 = scmp.eq.s32.totalorder (!%p3306_p13), %s2893_s29, 0 }
  0x7f   : > { %431 = sbr.rel (%p3306_p13) target bundleno = 2240 (0x8c0), region = 72 }
  0x86   : > { %2751 = dma.done.wait (%p3307_p1), [#allocation3], 16   ;;  %p3308_p0 = pmov %p3307_p1 }
  0x88   : > { %2753 = vsyncadd (%p3308_p0), [#allocation3], 4294967280  ;;  %p3309_p6 = pmov %p3308_p0 }
  0x89   : > { %p3310_p5 = pmov %p3308_p0 }
  0x8a   : > { %2755 = dma.done.wait (%p3309_p6), [#allocation6], 528  }
  0x8b   : > { %2757 = vsyncadd (%p3310_p5), [#allocation6], 4294966768  ;;  %p3311_p9 = pmov %p3308_p0 }
  0x8c   : > { %p3312_p12 = pmov %p3308_p0 }
  0x8d   : > { %2759 = dma.done.wait (%p3311_p9), [#allocation9], 16  }
  0x8e   : > { %2761 = vsyncadd (%p3312_p12), [#allocation9], 4294967280  ;;  %p487_p10 = scmp.lt.s32.totalorder %s2893_s29, 1  ;;  %vm505_vm0 = vcmask 261120   ;;  %v494_v0 = vld [vmem:[%s3267_s1] sm:$0xff]  ;;  %v495_v1 = vld [vmem:[%s3267_s1 + $0x8] sm:$0xff] }
  0x8f   : > { %v496_v2 = vld [vmem:[%s3267_s1 + $0x10] sm:$0xff]  ;;  %v2345_v3 = vpack.c.bf16 %v495_v1, %v494_v0  ;;  %v497_v4 = vld [vmem:[%s3267_s1 + $0x18] sm:$0xff]  ;;  %v2109_v8 = vld [vmem:[%s3268_s2] ss:$0 sm:$0xff]  ;;  %vm593_vm1 = vcmask 64512   ;;  %s2788_s28 = smov 120  }
  0x90   : > { %s488_s5 = scalar_select %p487_p10, %s2893_s29, 1  ;;  %v2349_v6 = vpack.c.bf16 %v497_v4, %v496_v2  ;;  %vm3087_vm2 = vmpackc.low %vm593_vm1, %vm593_vm1  ;;  %vm677_vm3 = vcmask 130048   ;;  %v787_v17 = vld [vmem:[%s3269_s3] sm:$0xff]  ;;  %vm1873_vm4 = vcmask 523264  }
  0x91   : > { %2346 = vmatprep.subr.bf16.mxu1 %v2345_v3  ;;  %s2789_s17 = smov 96   ;;  %s2792_s20 = smov 80  }
  0x92   : > { %s2160_s6 = sshll.u32 %s488_s5, 4  ;;  %2348 = vmatpush3.bf16.msra.mxu1 %v2345_v3  ;;  %s2790_s5 = smov 88  }
  0x93   : > { %s491_s23 = scalar_lea.vmem %s3266_s0, %s2160_s6  ;;  %2350 = vmatprep.subr.bf16.mxu1 %v2349_v6  ;;  %s2791_s6 = smov 112  }
  0x94   : > { %v3057_v5 = vld [vmem:[%s491_s23] sm:$0xff]  ;;  %v3061_v7 = vld [vmem:[%s491_s23 + $0x8] sm:$0xff]  ;;  %s2793_s30 = smov 56   ;;  %s2794_s23 = smov 72  }
  0x95   : > { %2236 = vmatprep.mubr.msk.f32.mxu1 %vm505_vm0, %v3057_v5  ;;  %s2795_s19 = smov 64   ;;  %s2796_s25 = smov 104  }
  0x96   : > { %2352 = vmatpush3.bf16.msra.mxu1 %v2349_v6  ;;  %s2797_s21 = smov 48   ;;  %s2798_s15 = smov 40  }
  0x97   : > { %s2161_s27 = sshll.u32 %s2893_s29, 8  ;;  %s3315_s13 = sld [smem:[#allocation23_spill]] }
  0x98   : > { %p3316_p3 = scmp.ne.s32.totalorder %s3298_s18, 0 }
  0x99   : > { %2237 = vmatmul.mubr.msk.f32.vlgmr.msra.gmra.mrb[0].mxu1 %vm505_vm0, %v3061_v7 }
 0x16c   : > { %v2238_v9 = vpop.f32.mrb[0].mxu1 }
 0x16d   : > { %v3068_v10 = vadd.f32 %v2238_v9, %v2109_v8  ;;  %v578_v11 = vpop.f32.mrb[1].mxu1 }
 0x16e   : > { %v3070_v12 = vadd.f32 %v2109_v8, %v578_v11 }
 0x170   : > { %788 = vrot.lane.b32.xlu1 %v3070_v12, %s2788_s28  ;;  %2243 = vmatprep.mubr.msk.f32.mxu1 %vm593_vm1, %v3070_v12  ;;  %v3077_v13 = vpack.i.bf16 %v3068_v10, %v3070_v12 }
 0x172   : > { %2519 = vrot.lane.b32.xlu0 %v3077_v13, %s2789_s17 }
 0x174   : > { %790 = vrot.lane.b32.xlu1 %v3068_v10, %s2788_s28  ;;  %s3219_s28 = scalar_lea.hbm %s3315_s13, %s2161_s27 }
 0x176   : > { %2524 = vrot.lane.b32.xlu0 %v3077_v13, %s2790_s5  ;;  %s2799_s5 = smov [#allocation10]  }
 0x178   : > { %1151 = vrot.lane.b32.xlu1 %v3070_v12, %s2791_s6 }
 0x17a   : > { %2529 = vrot.lane.b32.xlu0 %v3077_v13, %s2792_s20 }
 0x17e   : > { %1153 = vrot.lane.b32.xlu0 %v3068_v10, %s2791_s6  ;;  %s484_s6 = sand.u32 1, %s2772_s26  }
 0x17f   : > { %s2106_s20 = sshll.u32 %s484_s6, 4  ;;  %s3225_s29 = scalar_lea.sflag [#allocation4], %s484_s6 }
 0x180   : > { %s486_s14 = scalar_lea.vmem [#allocation10], %s2106_s20  ;;  %s2710_s20 = sshll.u32 %s2799_s5, 4  ;;  %s2711_s20 = int_to_ptr.vmem [resolvable:$false] %s2710_s20 }
 0x181   : > { %s1991_s22 = sshll.u32 %s486_s14, 4  ;;  %s3221_s22 = int_to_ptr.vmem [resolvable:$true] %s1991_s22 }
 0x182   : > { %s2706_s17 = scalar_lea.vmem %s3221_s22, 256  ;;  %p2713_p8 = scmp.lt.s32.totalorder %s3221_s22, %s2711_s20 }
 0x183   : > { %p2707_p2 = scmp.ne.s32.totalorder %s3221_s22, %s2706_s17 }
 0x185   : > { %p2708_p4 = pnand %p2707_p2, %p3316_p3 }
 0x187   : > { %p2709_p7 = pneg %p2708_p4 }
 0x1e2   : > { %v789_v24 = vpop.permute.xlu1 %788 }
 0x1e4   : > { %v2520_v14 = vpop.permute.xlu0 %2519 }
 0x1e5   : > { %v2522_v15 = vunpack.i.h.bf16 %v2520_v14  ;;  %v2521_v16 = vunpack.i.l.bf16 %v2520_v14 }
 0x1e6   : > { %v791_v28 = vpop.permute.xlu1 %790 }
 0x1e7   : > { %v2353_v18 = vpack.c.bf16 %v2522_v15, %v2521_v16  ;;  %v988_v16 = vld [vmem:[%s3269_s3 + $0x8] sm:$0xff] }
 0x1e8   : > { %v2525_v19 = vpop.permute.xlu0 %2524 }
 0x1e9   : > { %v2527_v20 = vunpack.i.h.bf16 %v2525_v19  ;;  %v2526_v21 = vunpack.i.l.bf16 %v2525_v19  ;;  %2355 = vmatprep.subr.msk.bf16.mxu1 %vm3087_vm2, %v2353_v18 }
 0x1ea   : > { %2358 = vmatpush3.bf16.xpose.msk.msra.mxu1 %vm3087_vm2, %v2353_v18  ;;  %v1152_v29 = vpop.permute.xlu1 %1151 }
 0x1eb   : > { %v2363_v22 = vpack.c.bf16 %v2527_v20, %v2526_v21 }
 0x1ec   : > { %v2530_v23 = vpop.permute.xlu0 %2529 }
 0x1ed   : > { %v2532_v25 = vunpack.i.h.bf16 %v2530_v23  ;;  %v2531_v26 = vunpack.i.l.bf16 %v2530_v23  ;;  %2365 = vmatprep.subr.msk.bf16.mxu1 %vm3087_vm2, %v2363_v22 }
 0x1ef   : > { %v2373_v27 = vpack.c.bf16 %v2532_v25, %v2531_v26 }
 0x1f0   : > { %v1154_v30 = vpop.permute.xlu0 %1153 }
 0x1f1   : > { %2244 = vmatmul.mubr.msk.f32.vlgmr.msra.gmra.mrb[2].mxu1 %vm593_vm1, %v3068_v10 }
 0x1f2   : > { %2368 = vmatpush3.bf16.xpose.msk.msra.mxu1 %vm3087_vm2, %v2363_v22  ;;  %2257 = vmatprep.mubr.msk.f32.mxu1 %vm593_vm1, %v789_v24 }
 0x1f3   : > { %2375 = vmatprep.subr.msk.bf16.mxu1 %vm3087_vm2, %v2373_v27 }
 0x1f9   : > { %2258 = vmatmul.mubr.msk.f32.vlgmr.msra.gmra.mrb[4].mxu1 %vm593_vm1, %v791_v28 }
 0x1fa   : > { %2378 = vmatpush3.bf16.xpose.msk.msra.mxu1 %vm3087_vm2, %v2373_v27  ;;  %2281 = vmatprep.mubr.msk.f32.mxu1 %vm593_vm1, %v1152_v29 }
 0x201   : > { %2282 = vmatmul.mubr.msk.f32.vlgmr.msra.gmra.mrb[6].mxu1 %vm593_vm1, %v1154_v30 }
 0x2c4   : > { %v2245_v31 = vpop.f32.mrb[2].mxu1 }
 0x2c5   : > { %v668_v32 = vpop.f32.mrb[3].mxu1  ;;  %v681_v33 = vsel %vm677_vm3, %v2245_v31, -inf }
 0x2c6   : > { %682 = vmax.xlane.f32.xlu0 %v681_v33  ;;  %v678_v34 = vsel %vm677_vm3, %v668_v32, -inf }
 0x2c7   : > { %679 = vmax.xlane.f32.xlu1 %v678_v34 }
 0x2cc   : > { %v2259_v35 = vpop.f32.mrb[4].mxu1 }
 0x2cd   : > { %v870_v36 = vpop.f32.mrb[5].mxu1  ;;  %v882_v37 = vsel %vm677_vm3, %v2259_v35, -inf }
 0x2ce   : > { %883 = vmax.xlane.f32.xlu1 %v882_v37  ;;  %v879_v38 = vsel %vm677_vm3, %v870_v36, -inf }
 0x2cf   : > { %880 = vmax.xlane.f32.xlu0 %v879_v38 }
 0x2d4   : > { %v3113_v39 = vpop.f32.mrb[6].mxu1 }
 0x2d5   : > { %v3115_v40 = vpop.f32.mrb[7].mxu1  ;;  %v1245_v15 = vsel %vm677_vm3, %v3113_v39, -inf }
 0x2d6   : > { %v1242_v11 = vsel %vm677_vm3, %v3115_v40, -inf }
 0x2df   : > { %2539 = vrot.lane.b32.xlu1 %v3077_v13, %s2793_s30  ;;  %s2712_s30 = scalar_lea.vmem %s2711_s20, 512 }
 0x2e0   : > { %p2714_p11 = scmp.lt.s32.totalorder %s2712_s30, %s2706_s17 }
 0x2e2   : > { %p2715_p13 = por %p2714_p11, %p2713_p8 }
 0x2e3   : > { %2544 = vrot.lane.b32.xlu1 %v3077_v13, %s2794_s23 }
 0x2e4   : > { %p2716_p1 = pnand %p2715_p13, %p2709_p7 }
 0x2e5   : > { %2534 = vrot.lane.b32.xlu0 %v3077_v13, %s2795_s19 }
 0x2e7   : > { %1437 = vrot.lane.b32.xlu1 %v3068_v10, %s2796_s25 }
 0x2e9   : > { %1435 = vrot.lane.b32.xlu0 %v3070_v12, %s2796_s25 }
 0x353   : > { %v683_v41 = vpop.xlane.xlu0 %682 }
 0x354   : > { %v680_v42 = vpop.xlane.xlu1 %679  ;;  %v685_v44 = vsub.f32 %v2245_v31, %v683_v41 }
 0x355   : > { %v684_v43 = vsub.f32 %v668_v32, %v680_v42 }
 0x356   : > { %v688_v46 = vmul.f32 1.442695, %v685_v44 }
 0x357   : > { %v686_v45 = vmul.f32 1.442695, %v684_v43 }
 0x359   : > { %2558 = vpow2.f32 %v686_v45 }
 0x35a   : > { %2560 = vpow2.f32 %v688_v46 }
 0x35b   : > { %v884_v47 = vpop.xlane.xlu1 %883 }
 0x35c   : > { %v886_v48 = vsub.f32 %v2259_v35, %v884_v47  ;;  %v881_v49 = vpop.xlane.xlu0 %880 }
 0x35d   : > { %v885_v50 = vsub.f32 %v870_v36, %v881_v49 }
 0x35e   : > { %v889_v51 = vmul.f32 1.442695, %v886_v48 }
 0x35f   : > { %v887_v52 = vmul.f32 1.442695, %v885_v50  ;;  %v2540_v53 = vpop.permute.xlu1 %2539  ;;  %v1351_v50 = vld [vmem:[%s3269_s3 + $0x10] sm:$0xff] }
 0x360   : > { %2562 = vpow2.f32 %v889_v51  ;;  %v2542_v54 = vunpack.i.h.bf16 %v2540_v53  ;;  %v2535_v55 = vpop.permute.xlu0 %2534  ;;  %v2541_v56 = vunpack.i.l.bf16 %v2540_v53 }
 0x361   : > { %2564 = vpow2.f32 %v887_v52  ;;  %v2537_v57 = vunpack.i.h.bf16 %v2535_v55  ;;  %v2536_v58 = vunpack.i.l.bf16 %v2535_v55 }
 0x362   : > { %v2369_v1 = vpack.c.bf16 %v2542_v54, %v2541_v56 }
 0x363   : > { %v2559_v59 = vpop.eup %2558  ;;  %v2545_v60 = vpop.permute.xlu1 %2544  ;;  %v2359_v61 = vpack.c.bf16 %v2537_v57, %v2536_v58 }
 0x364   : > { %v2547_v62 = vunpack.i.h.bf16 %v2545_v60  ;;  %v2546_v63 = vunpack.i.l.bf16 %v2545_v60  ;;  %v1436_v0 = vpop.permute.xlu0 %1435  ;;  %2250 = vmatprep.mubr.msk.f32.mxu0 %vm677_vm3, %v2559_v59  ;;  %v2561_v3 = vpop.eup %2560  ;;  %v690_v12 = vsel %vm677_vm3, %v2559_v59, 0.0 }
 0x365   : > { %2360 = vmatprep.subr.bf16.mxu0 %v2359_v61  ;;  %2300 = vmatprep.mubr.msk.f32.mxu1 %vm593_vm1, %v1436_v0  ;;  %v693_v14 = vsel %vm677_vm3, %v2561_v3, 0.0 }
 0x366   : > { %v2383_v2 = vpack.c.bf16 %v2547_v62, %v2546_v63  ;;  %2362 = vmatpush3.bf16.msra.mxu0 %v2359_v61 }
 0x367   : > { %2370 = vmatprep.subr.bf16.mxu0 %v2369_v1  ;;  %v1438_v10 = vpop.permute.xlu1 %1437 }
 0x368   : > { %2385 = vmatprep.subr.msk.bf16.mxu1 %vm3087_vm2, %v2383_v2 }
 0x369   : > { %2251 = vmatmul.mubr.msk.f32.vlgmr.msra.gmra.mrb[0].mxu0 %vm677_vm3, %v2561_v3  ;;  %2388 = vmatpush3.bf16.xpose.msk.msra.mxu1 %vm3087_vm2, %v2383_v2 }
 0x36a   : > { %v2563_v4 = vpop.eup %2562  ;;  %2372 = vmatpush3.bf16.msra.mxu0 %v2369_v1 }
 0x36b   : > { %v2565_v6 = vpop.eup %2564  ;;  %v894_v8 = vsel %vm677_vm3, %v2563_v4, 0.0  ;;  %2267 = vmatprep.subr.mxu0 %v988_v16 }
 0x36c   : > { %2264 = vmatprep.mubr.msk.f32.mxu0 %vm677_vm3, %v2565_v6  ;;  %895 = vadd.xlane.f32.xlu1 %v894_v8  ;;  %v891_v9 = vsel %vm677_vm3, %v2565_v6, 0.0 }
 0x36d   : > { %892 = vadd.xlane.f32.xlu0 %v891_v9  ;;  %2265 = vmatmul.mubr.msk.f32.vlgmr.msra.gmra.mrb[2].mxu0 %vm677_vm3, %v2563_v4 }
 0x36e   : > { %2268 = vmatpush3.msra.mxu0 %v988_v16 }
 0x36f   : > { %2272 = vmatprep.subr.mxu0 %v787_v17 }
 0x370   : > { %1243 = vmax.xlane.f32.xlu1 %v1242_v11  ;;  %2301 = vmatmul.mubr.msk.f32.vlgmr.msra.gmra.mrb[8].mxu1 %vm593_vm1, %v1438_v10 }
 0x371   : > { %691 = vadd.xlane.f32.xlu0 %v690_v12  ;;  %v1635_v12 = vld [vmem:[%s3269_s3 + $0x18] sm:$0xff] }
 0x375   : > { %694 = vadd.xlane.f32.xlu0 %v693_v14 }
 0x379   : > { %1246 = vmax.xlane.f32.xlu0 %v1245_v15 }
 0x381   : > { %2549 = vrot.lane.b32.xlu1 %v3077_v13, %s2797_s21 }
 0x385   : > { %2554 = vrot.lane.b32.xlu1 %v3077_v13, %s2798_s15 }
 0x3f9   : > { %v896_v21 = vpop.xlane.xlu1 %895 }
 0x3fa   : > { %v893_v18 = vpop.xlane.xlu0 %892 }
 0x3fb   : > { %2566 = vrcp.f32 %v893_v18 }
 0x3fc   : > { %2568 = vrcp.f32 %v896_v21 }
 0x3fd   : > { %v1244_v23 = vpop.xlane.xlu1 %1243 }
 0x3fe   : > { %v692_v19 = vpop.xlane.xlu0 %691  ;;  %v1248_v13 = vsub.f32 %v3115_v40, %v1244_v23  ;;  %v1749_v23 = vld [vmem:[#allocation7 + $0x8] sm:$0xff] }
 0x3ff   : > { %2570 = vrcp.f32 %v692_v19 }
 0x400   : > { %v1250_v26 = vmul.f32 1.442695, %v1248_v13  ;;  %v1750_v13 = vld [vmem:[#allocation7 + $0x10] sm:$0xff] }
 0x401   : > { %v2550_v29 = vpop.permute.xlu1 %2549 }
 0x402   : > { %v695_v20 = vpop.xlane.xlu0 %694  ;;  %v2552_v32 = vunpack.i.h.bf16 %v2550_v29  ;;  %v2551_v33 = vunpack.i.l.bf16 %v2550_v29 }
 0x404   : > { %v2379_v41 = vpack.c.bf16 %v2552_v32, %v2551_v33 }
 0x405   : > { %v2567_v31 = vpop.eup %2566  ;;  %v2555_v48 = vpop.permute.xlu1 %2554 }
 0x406   : > { %v1247_v22 = vpop.xlane.xlu0 %1246  ;;  %v2569_v35 = vpop.eup %2568  ;;  %v2557_v51 = vunpack.i.h.bf16 %v2555_v48  ;;  %v2556_v52 = vunpack.i.l.bf16 %v2555_v48  ;;  %v1865_v48 = vld [vmem:[%s3275_s9 + $0x38] sm:$0xff] }
 0x407   : > { %v1249_v24 = vsub.f32 %v3113_v39, %v1247_v22  ;;  %v1748_v22 = vld [vmem:[#allocation7] sm:$0xff] }
 0x408   : > { %v2389_v54 = vpack.c.bf16 %v2557_v51, %v2556_v52 }
 0x409   : > { %v1252_v25 = vmul.f32 1.442695, %v1249_v24  ;;  %v2571_v39 = vpop.eup %2570  ;;  %v2393_v24 = vpack.c.bf16 %v1749_v23, %v1748_v22 }
 0x40b   : > { %2572 = vpow2.f32 %v1252_v25  ;;  %2394 = vmatprep.subr.bf16.mxu1 %v2393_v24  ;;  %v1751_v25 = vld [vmem:[#allocation7 + $0x18] sm:$0xff] }
 0x40c   : > { %2574 = vpow2.f32 %v1250_v26  ;;  %2396 = vmatpush3.bf16.msra.mxu1 %v2393_v24  ;;  %v2397_v26 = vpack.c.bf16 %v1751_v25, %v1750_v13 }
 0x40d   : > { %2576 = vrcp.f32 %v695_v20 }
 0x40e   : > { %2398 = vmatprep.subr.bf16.mxu1 %v2397_v26 }
 0x410   : > { %2400 = vmatpush3.bf16.msra.mxu1 %v2397_v26 }
 0x415   : > { %v2573_v44 = vpop.eup %2572 }
 0x416   : > { %v2575_v45 = vpop.eup %2574  ;;  %v1257_v46 = vsel %vm677_vm3, %v2573_v44, 0.0 }
 0x417   : > { %v2577_v47 = vpop.eup %2576  ;;  %v1254_v53 = vsel %vm677_vm3, %v2575_v45, 0.0 }
 0x43c   : > { %v2252_v27 = vpop.f32.mrb[0].mxu0 }
 0x43d   : > { %v774_v28 = vpop.f32.mrb[1].mxu0  ;;  %v786_v49 = vmul.f32 %v2577_v47, %v2252_v27  ;;  %v2144_v27 = vld [vmem:[%s3270_s4] ss:$0 sm:$0xff]  ;;  %v1864_v47 = vld [vmem:[%s3275_s9 + $0x30] sm:$0xff] }
 0x43e   : > { %v785_v42 = vmul.f32 %v2571_v39, %v774_v28 }
 0x440   : > { %v2266_v30 = vpop.f32.mrb[2].mxu0 }
 0x441   : > { %v975_v34 = vpop.f32.mrb[3].mxu0  ;;  %v987_v37 = vmul.f32 %v2569_v35, %v2266_v30 }
 0x442   : > { %v986_v36 = vmul.f32 %v2567_v31, %v975_v34  ;;  %v2145_v31 = vld [vmem:[#allocation2] ss:$0 sm:$0xff] }
 0x443   : > { %v2302_v38 = vpop.f32.mrb[8].mxu1 }
 0x444   : > { %2269 = vmatprep.mubr.msk.f32.mxu0 %vm593_vm1, %v986_v36  ;;  %v1517_v40 = vpop.f32.mrb[9].mxu1  ;;  %v1529_v55 = vsel %vm677_vm3, %v2302_v38, -inf  ;;  %v2146_v36 = vld [vmem:[#allocation5] ss:$0 sm:$0xff] }
 0x445   : > { %2270 = vmatmul.mubr.msk.f32.vlgmr.msra.gmra.mrb[4].mxu0 %vm593_vm1, %v987_v37  ;;  %v1526_v43 = vsel %vm677_vm3, %v1517_v40, -inf }
 0x446   : > { %2273 = vmatpush3.msra.mxu0 %v787_v17  ;;  %1527 = vmax.xlane.f32.xlu0 %v1526_v43 }
 0x447   : > { %2274 = vmatprep.mubr.msk.f32.mxu0 %vm593_vm1, %v785_v42  ;;  %2380 = vmatprep.subr.bf16.mxu0 %v2379_v41  ;;  %v1861_v42 = vld [vmem:[%s3275_s9 + $0x18] sm:$0xff] }
 0x44a   : > { %1258 = vadd.xlane.f32.xlu0 %v1257_v46 }
 0x44d   : > { %2275 = vmatmul.mubr.msk.f32.vlgmr.msra.gmra.mrb[4].mxu0 %vm593_vm1, %v786_v49  ;;  %v2413_v49 = vpack.c.bf16 %v1865_v48, %v1864_v47 }
 0x44e   : > { %2382 = vmatpush3.bf16.msra.mxu0 %v2379_v41  ;;  %1255 = vadd.xlane.f32.xlu0 %v1254_v53  ;;  %v1859_v41 = vld [vmem:[%s3275_s9 + $0x8] sm:$0xff] }
 0x44f   : > { %2288 = vmatprep.mubr.msk.f32.mxu0 %vm677_vm3, %v2575_v45  ;;  %2291 = vmatprep.subr.mxu0 %v1351_v50  ;;  %v1863_v45 = vld [vmem:[%s3275_s9 + $0x28] sm:$0xff] }
 0x451   : > { %2289 = vmatmul.mubr.msk.f32.vlgmr.msra.gmra.mrb[6].mxu0 %vm677_vm3, %v2573_v44  ;;  %v1862_v44 = vld [vmem:[%s3275_s9 + $0x20] sm:$0xff] }
 0x452   : > { %2292 = vmatpush3.msra.mxu0 %v1351_v50  ;;  %1530 = vmax.xlane.f32.xlu0 %v1529_v55  ;;  %v2409_v46 = vpack.c.bf16 %v1863_v45, %v1862_v44  ;;  %v2147_v50 = vld [vmem:[#allocation8] ss:$0 sm:$0xff] }
 0x453   : > { %2390 = vmatprep.subr.bf16.mxu0 %v2389_v54 }
 0x4d3   : > { %v1528_v56 = vpop.xlane.xlu0 %1527 }
 0x4d4   : > { %v1532_v57 = vsub.f32 %v1517_v40, %v1528_v56  ;;  %v1858_v40 = vld [vmem:[%s3275_s9] sm:$0xff] }
 0x4d6   : > { %v1534_v58 = vmul.f32 1.442695, %v1532_v57 }
 0x4d7   : > { %v1259_v59 = vpop.xlane.xlu0 %1258 }
 0x4d8   : > { %2578 = vpow2.f32 %v1534_v58 }
 0x4db   : > { %v1256_v60 = vpop.xlane.xlu0 %1255 }
 0x4df   : > { %v1531_v61 = vpop.xlane.xlu0 %1530 }
 0x4e0   : > { %v1533_v62 = vsub.f32 %v2302_v38, %v1531_v61 }
 0x4e2   : > { %v2579_v63 = vpop.eup %2578  ;;  %v1536_v0 = vmul.f32 1.442695, %v1533_v62 }
 0x4e3   : > { %v1538_v1 = vsel %vm677_vm3, %v2579_v63, 0.0 }
 0x4e4   : > { %2580 = vpow2.f32 %v1536_v0  ;;  %1539 = vadd.xlane.f32.xlu0 %v1538_v1 }
 0x4e5   : > { %2582 = vrcp.f32 %v1259_v59 }
 0x4e6   : > { %2584 = vrcp.f32 %v1256_v60 }
 0x4ee   : > { %v2581_v2 = vpop.eup %2580 }
 0x4ef   : > { %v1541_v3 = vsel %vm677_vm3, %v2581_v2, 0.0  ;;  %v2583_v4 = vpop.eup %2582 }
 0x4f0   : > { %1542 = vadd.xlane.f32.xlu1 %v1541_v3  ;;  %v2585_v8 = vpop.eup %2584 }
 0x524   : > { %v2290_v6 = vpop.f32.mrb[6].mxu0 }
 0x525   : > { %v1350_v9 = vmul.f32 %v2583_v4, %v2290_v6  ;;  %v1338_v10 = vpop.f32.mrb[7].mxu0 }
 0x526   : > { %v1349_v11 = vmul.f32 %v2585_v8, %v1338_v10 }
 0x528   : > { %2293 = vmatprep.mubr.msk.f32.mxu0 %vm593_vm1, %v1349_v11  ;;  %v2150_v11 = vld [vmem:[%s3276_s10] ss:$0 sm:$0xff] }
 0x529   : > { %2294 = vmatmul.mubr.msk.f32.vlgmr.msra.gmra.mrb[4].mxu0 %vm593_vm1, %v1350_v9 }
 0x52a   : > { %2392 = vmatpush3.bf16.msra.mxu0 %v2389_v54  ;;  %2307 = vmatprep.mubr.msk.f32.mxu0 %vm677_vm3, %v2579_v63 }
 0x52b   : > { %2310 = vmatprep.subr.mxu0 %v1635_v12 }
 0x52d   : > { %2308 = vmatmul.mubr.msk.f32.vlgmr.msra.gmra.mrb[8].mxu0 %vm677_vm3, %v2581_v2 }
 0x52e   : > { %2311 = vmatpush3.msra.mxu0 %v1635_v12 }
 0x571   : > { %v1540_v14 = vpop.xlane.xlu0 %1539 }
 0x572   : > { %2586 = vrcp.f32 %v1540_v14 }
 0x57c   : > { %v2587_v17 = vpop.eup %2586 }
 0x57d   : > { %v1543_v15 = vpop.xlane.xlu1 %1542 }
 0x57e   : > { %2588 = vrcp.f32 %v1543_v15 }
 0x588   : > { %v2589_v19 = vpop.eup %2588 }
 0x600   : > { %v2309_v16 = vpop.f32.mrb[8].mxu0 }
 0x601   : > { %v1622_v18 = vpop.f32.mrb[9].mxu0  ;;  %v1634_v21 = vmul.f32 %v2589_v19, %v2309_v16  ;;  %v2153_v16 = vld [vmem:[%s3277_s11] ss:$0 sm:$0xff] }
 0x602   : > { %v1633_v20 = vmul.f32 %v2587_v17, %v1622_v18  ;;  %v2154_v19 = vld [vmem:[%s3278_s12] ss:$0 sm:$0xff] }
 0x604   : > { %2312 = vmatprep.mubr.msk.f32.mxu0 %vm593_vm1, %v1633_v20 }
 0x605   : > { %2313 = vmatmul.mubr.msk.f32.vlgmr.msra.gmra.mrb[4].mxu0 %vm593_vm1, %v1634_v21 }
 0x6d8   : > { %v2314_v28 = vpop.f32.mrb[4].mxu0 }
 0x6d9   : > { %v1727_v29 = vadd.f32 %v2314_v28, %v2144_v27  ;;  %v1708_v30 = vpop.f32.mrb[5].mxu0 }
 0x6da   : > { %v1726_v32 = vadd.f32 %v2144_v27, %v1708_v30 }
 0x6db   : > { %v1729_v33 = vadd.f32 %v1727_v29, %v3061_v7  ;;  %v2401_v7 = vpack.c.bf16 %v1859_v41, %v1858_v40 }
 0x6dc   : > { %v1728_v34 = vadd.f32 %v1726_v32, %v3057_v5  ;;  %v1860_v5 = vld [vmem:[%s3275_s9 + $0x10] sm:$0xff] }
 0x6dd   : > { %v1738_v35 = vmul.f32 %v2145_v31, %v1729_v33  ;;  %v2405_v43 = vpack.c.bf16 %v1861_v42, %v1860_v5  ;;  %2402 = vmatprep.subr.bf16.mxu0 %v2401_v7 }
 0x6de   : > { %v1737_v37 = vmul.f32 %v2145_v31, %v1728_v34  ;;  %2404 = vmatpush3.bf16.msra.mxu0 %v2401_v7 }
 0x6df   : > { %v1747_v39 = vadd.f32 %v2146_v36, %v1738_v35  ;;  %2406 = vmatprep.subr.bf16.mxu0 %v2405_v43 }
 0x6e0   : > { %v1746_v38 = vadd.f32 %v2146_v36, %v1737_v37 }
 0x6e2   : > { %2323 = vmatprep.mubr.msk.f32.mxu1 %vm505_vm0, %v1746_v38  ;;  %2408 = vmatpush3.bf16.msra.mxu0 %v2405_v43 }
 0x6e3   : > { %2324 = vmatmul.mubr.msk.f32.vlgmr.msra.gmra.mrb[10].mxu1 %vm505_vm0, %v1747_v39  ;;  %2410 = vmatprep.subr.bf16.mxu0 %v2409_v46 }
 0x6e6   : > { %2412 = vmatpush3.bf16.msra.mxu0 %v2409_v46 }
 0x6e7   : > { %2414 = vmatprep.subr.bf16.mxu0 %v2413_v49 }
 0x6ea   : > { %2416 = vmatpush3.bf16.msra.mxu0 %v2413_v49 }
 0x7b6   : > { %v2325_v51 = vpop.f32.mrb[10].mxu1 }
 0x7b7   : > { %v1837_v52 = vadd.f32 %v2325_v51, %v2147_v50  ;;  %v1831_v53 = vpop.f32.mrb[11].mxu1 }
 0x7b8   : > { %v1832_v54 = vadd.f32 %v2147_v50, %v1831_v53 }
 0x7b9   : > { %v1843_v55 = vmul.f32 0.044715, %v1837_v52  ;;  %v1841_v8 = vmul.f32 0.5, %v1837_v52 }
 0x7ba   : > { %v1842_v56 = vmul.f32 0.044715, %v1832_v54  ;;  %v1840_v4 = vmul.f32 0.5, %v1832_v54 }
 0x7bb   : > { %v1845_v57 = vmul.f32 %v1843_v55, %v1837_v52 }
 0x7bc   : > { %v1844_v58 = vmul.f32 %v1842_v56, %v1832_v54 }
 0x7bd   : > { %v1847_v59 = vmul.f32 %v1845_v57, %v1837_v52 }
 0x7be   : > { %v1846_v60 = vmul.f32 %v1844_v58, %v1832_v54 }
 0x7bf   : > { %v1849_v61 = vadd.f32 %v1847_v59, %v1837_v52 }
 0x7c0   : > { %v1848_v62 = vadd.f32 %v1846_v60, %v1832_v54 }
 0x7c1   : > { %v1851_v63 = vmul.f32 0.7978846, %v1849_v61 }
 0x7c2   : > { %v1850_v0 = vmul.f32 0.7978846, %v1848_v62 }
 0x7c3   : > { %2590 = vtanh.f32 %v1851_v63 }
 0x7c4   : > { %2592 = vtanh.f32 %v1850_v0 }
 0x7cd   : > { %v2591_v1 = vpop.eup %2590 }
 0x7ce   : > { %v2593_v2 = vpop.eup %2592  ;;  %v1855_v3 = vadd.f32 1.0, %v2591_v1 }
 0x7cf   : > { %v1854_v6 = vadd.f32 1.0, %v2593_v2 }
 0x7d0   : > { %v1857_v10 = vmul.f32 %v1855_v3, %v1841_v8 }
 0x7d1   : > { %v1856_v9 = vmul.f32 %v1854_v6, %v1840_v4 }
 0x7d3   : > { %2342 = vmatprep.mubr.msk.f32.mxu0 %vm1873_vm4, %v1856_v9 }
 0x7d4   : > { %2343 = vmatmul.mubr.msk.f32.vlgmr.msra.gmra.mrb[10].mxu0 %vm1873_vm4, %v1857_v10 }
 0x8a7   : > { %v2344_v12 = vpop.f32.mrb[10].mxu0 }
 0x8a8   : > { %v1952_v14 = vadd.f32 %v2344_v12, %v2150_v11  ;;  %v1946_v15 = vpop.f32.mrb[11].mxu0 }
 0x8a9   : > { %v1947_v17 = vadd.f32 %v2150_v11, %v1946_v15 }
 0x8aa   : > { %v1956_v18 = vadd.f32 %v1952_v14, %v1747_v39 }
 0x8ab   : > { %v1955_v20 = vadd.f32 %v1947_v17, %v1746_v38 }
 0x8ac   : > { %v1965_v21 = vmul.f32 %v2153_v16, %v1956_v18 }
 0x8ad   : > { %v1964_v22 = vmul.f32 %v2153_v16, %v1955_v20 }
 0x8ae   : > { %v1974_v23 = vadd.f32 %v2154_v19, %v1965_v21 }
 0x8af   : > { %v1973_v24 = vadd.f32 %v2154_v19, %v1964_v22 }
 0x8b0   : > { %1976 = vst.msk [vmem:[%s486_s14 + $0x8] sm:$0xff] %vm505_vm0, %v1974_v23 }
 0x8b1   : > { %1975 = vst.msk [vmem:[%s486_s14] sm:$0xff] %vm505_vm0, %v1973_v24 }
 0x8b2   : > { %2719 = shalt.err (!%p2716_p1)
}
 0x8b3   : > { %s2720_s6 = scalar_lea.hbm %s3219_s28, 256  ;;  %s2724_s25 = scalar_lea.hbm %s3315_s13, 512 }
 0x8b4   : > { %p2721_p0 = scmp.ne.s32.totalorder %s3219_s28, %s2720_s6  ;;  %p2725_p9 = scmp.lt.u32.totalorder %s3219_s28, %s3315_s13 }
 0x8b5   : > { %p2726_p12 = scmp.lt.u32.totalorder %s2724_s25, %s2720_s6  ;;  %p2728_p2 = scmp.lt.u32.totalorder %s2720_s6, %s3219_s28 }
 0x8b6   : > { %p2722_p6 = pnand %p2721_p0, %p3316_p3 }
 0x8b7   : > { %p2727_p10 = por %p2726_p12, %p2725_p9 }
 0x8b8   : > { %p2723_p5 = pneg %p2722_p6 }
 0x8b9   : > { %p2729_p4 = por %p2728_p2, %p2727_p10 }
 0x8bb   : > { %p2730_p7 = pnand %p2729_p4, %p2723_p5 }
 0x8bd   : > { %2733 = shalt.err (!%p2730_p7)
}
 0x8be   : > { %s2800_s27 = smov 128   ;;  %s2801_s14 = smov 8  }
 0x8bf   : > { %2439 = dma.vmem_to_hbm [thread:$0]  (%p3316_p3), %s3221_s22, 256, %s3219_s28, %s3225_s29, %s2800_s27, %s2800_s27, %s2801_s14  }
 0x8c0 PF: > { %s3317_s24 = sld [smem:[#allocation17_spill]]  ;;  %s3318_s16 = sld [smem:[#allocation15_spill]] }
 0x8c1   : > { %s3319_s17 = sld [smem:[#allocation20_spill]] }
 0x8c6   : > { %p2466_p8 = scmp.ge.s32.totalorder %s3317_s24, 2  ;;  %s2006_s5 = sand.u32 1, %s3318_s16  }
 0x8c7   : > { %p3320_p11 = scmp.ne.s32.totalorder %s3319_s17, 0  ;;  %s2007_s20 = scalar_lea.sflag [#allocation4], %s2006_s5 }
 0x8c9   : > { %p2455_p13 = pnand %p2466_p8, %p3320_p11 }
 0x8cb   : > { %2763 = dma.done.wait (!%p2455_p13), %s2007_s20, 256  }
 0x8cc   : > { %2765 = vsyncadd (!%p2455_p13), %s2007_s20, 4294967040  ;;  %s3321_s28 = sld [smem:[#allocation18_spill]]  ;;  %s3322_s30 = sld [smem:[#allocation16_spill]] }
 0x8cd   : > { %s3323_s27 = sld [smem:[#allocation19_spill]]  ;;  %s3324_s25 = smov %s2772_s26 }
 0x8d2   : > { %p26_p1 = scmp.ge.s32.totalorder %s3321_s28, 4   ;;  %s3325_s26 = smov %s3322_s30 }
 0x8d4   :  { %28 = sbr.rel (!%p26_p1) target bundleno = 10 (0xa), region = 124 }
 0x8db   :  { %2012 = vsyncpa [#allocation3], 1 }
 0x8dc   :  { %2014 = vsyncpa [#allocation3 + $0x1], 1 }
 0x8dd   :  { %2015 = vsyncpa [#allocation6], 1 }
 0x8de   :  { %2016 = vsyncpa [#allocation9], 1 }
 0x8df   :  { %2017 = vsyncpa [#allocation4], 1 }
 0x8e0   :  { %2019 = vsyncpa [#allocation4 + $0x1], 1 }

</bundles_post_ra>
